<compile_context>
chip_gen: v7x
topology: tpu7x:2x2x1
jax: 0.10.0
libtpu: 0.0.40
codegen_flags: <defaults>
</compile_context>

<pallas_src>
import functools

import jax
import jax.numpy as jnp
from jax import lax
from jax.experimental import pallas as pl
from jax.experimental.pallas import tpu as pltpu

EPS = 1e-5  # nn.InstanceNorm1d / nn.LayerNorm default


def _shifted_taps(a, K, pad_left):
    """im2col: (BB, L, C) -> (BB, L, K*C); tap t is a[:, l + t - pad_left, :],
    zero outside [0, L).  Shifts use pltpu.roll (XLU) + an iota edge mask."""
    BB, L, C = a.shape
    if K == 1:
        return a
    lidx = jax.lax.broadcasted_iota(jnp.int32, (L, 1), 0)   # broadcasts over BB, C
    cols = []
    for t in range(K):
        d = t - pad_left                                     # tap[l] = a[l + d]
        if d == 0:
            cols.append(a)
        else:
            rolled = pltpu.roll(a, shift=(-d) % L, axis=1)   # rolled[l] = a[(l+d) % L]
            valid = jnp.logical_and(lidx + d >= 0, lidx + d < L)
            cols.append(jnp.where(valid, rolled, 0.0))
    return jnp.concatenate(cols, axis=-1)


def _fused_kernel(nhead, x_ref,
                  w1_ref, b1_ref, w2_ref, b2_ref, prelu_ref,
                  wq_ref, bq_ref, wkv_ref, bkv_ref, wo_ref, bo_ref,
                  g1_ref, be1_ref, wf1_ref, bf1_ref, wf2_ref, bf2_ref,
                  g2_ref, be2_ref, wl_ref, bl_ref, out_ref):
    f32, bf16 = jnp.float32, jnp.bfloat16

    x = x_ref[...].astype(f32)                       # (BB, Cin, L), native NCL
    BB, Cin, L = x.shape
    KCin, Cout = w1_ref.shape
    K = KCin // Cin
    pad_left = K // 2                                # == module padding_num[0]
    D = Cout
    hd = D // nhead
    scale = 1.0 / (hd ** 0.5)

    # ----------------------------- CNN block -----------------------------
    # InstanceNorm1d #1: per-(batch, channel) stats over time, single pass.
    m1 = jnp.mean(x, axis=2, keepdims=True)
    v1 = jnp.mean(x * x, axis=2, keepdims=True) - m1 * m1
    xn_ncl = (x - m1) * lax.rsqrt(v1 + EPS)
    # One in-kernel (Cin, L) -> (L, Cin) transpose; from here on everything is
    # channels-last so batch*time folds into the matmul M dimension.
    xn = jnp.transpose(xn_ncl, (0, 2, 1))            # (BB, L, Cin)

    # conv1 as a single im2col matmul over all (batch, time) rows (bf16 MXU).
    xcol = _shifted_taps(xn, K, pad_left).reshape(BB * L, K * Cin)
    y = jnp.dot(xcol.astype(bf16), w1_ref[...],
                preferred_element_type=f32) + b1_ref[...]
    y = jnp.where(y >= 0.0, y, prelu_ref[0] * y)     # PReLU (shared slope)

    # InstanceNorm1d #2 (stats over time = axis 1), single pass.
    y3 = y.reshape(BB, L, Cout)
    m2 = jnp.mean(y3, axis=1, keepdims=True)
    v2 = jnp.mean(y3 * y3, axis=1, keepdims=True) - m2 * m2
    yn = (y3 - m2) * lax.rsqrt(v2 + EPS)

    # conv2 as a single im2col matmul.
    ycol = _shifted_taps(yn, K, pad_left).reshape(BB * L, K * Cout)
    y2 = jnp.dot(ycol.astype(bf16), w2_ref[...],
                 preferred_element_type=f32) + b2_ref[...]
    y2 = jnp.where(y2 >= 0.0, y2, prelu_ref[1] * y2)

    # residual: + the *normalized* input tiled along channels (the module
    # reassigns x = normalization1(x) before `y + x.repeat(1, rep, 1)`).
    rep = Cout // Cin
    res = xn if rep == 1 else jnp.concatenate([xn] * rep, axis=-1)
    z = y2 + res.reshape(BB * L, Cout)               # (BB*L, D) channels-last
    # (the module's permute(0, 2, 1) is absorbed by this layout)

    # ------- TransformerEncoderLayer (post-norm, ReLU, eval dropout) -------
    # Only x[:, -1, :] feeds the final Linear, so K/V are projected for all
    # rows but Q / softmax / out-proj / norms / FFN run on the last row only.
    kv = jnp.dot(z.astype(bf16), wkv_ref[...],
                 preferred_element_type=f32) + bkv_ref[...]
    kv_b = kv.reshape(BB, L, 2 * D).astype(bf16)

    z_last = z.reshape(BB, L, D)[:, L - 1, :]        # (BB, D)
    q = jnp.dot(z_last.astype(bf16), wq_ref[...],
                preferred_element_type=f32) + bq_ref[...]
    q_b = q.reshape(BB, 1, D).astype(bf16)           # keep a singleton query axis

    # nhead is small & static; with one query row per batch the per-head
    # tensors are tiny, so a 4-D head-batched einsum would only add relayouts.
    heads = []
    for h in range(nhead):
        qh = q_b[:, :, h * hd:(h + 1) * hd]                       # (BB, 1, hd)
        kh = kv_b[:, :, h * hd:(h + 1) * hd]                      # (BB, L, hd)
        vh = kv_b[:, :, D + h * hd:D + (h + 1) * hd]              # (BB, L, hd)
        s = jnp.einsum('bqd,bkd->bqk', qh, kh,
                       preferred_element_type=f32) * scale        # (BB, 1, L)
        s = s - jnp.max(s, axis=-1, keepdims=True)
        p = jnp.exp(s)
        p = p * pl.reciprocal(jnp.sum(p, axis=-1, keepdims=True), approx=True)
        heads.append(jnp.einsum('bqk,bkd->bqd', p.astype(bf16), vh,
                                preferred_element_type=f32))      # (BB, 1, hd)
    attn = jnp.concatenate(heads, axis=-1).reshape(BB, D)
    attn = jnp.dot(attn.astype(bf16), wo_ref[...],
                   preferred_element_type=f32) + bo_ref[...]

    # residual + LayerNorm1 (single-pass stats), last row only.
    x1 = z_last + attn
    mu = jnp.mean(x1, axis=-1, keepdims=True)
    var = jnp.mean(x1 * x1, axis=-1, keepdims=True) - mu * mu
    x1 = (x1 - mu) * lax.rsqrt(var + EPS) * g1_ref[...] + be1_ref[...]

    # feed-forward (ReLU), last row only.
    h1 = jnp.dot(x1.astype(bf16), wf1_ref[...],
                 preferred_element_type=f32) + bf1_ref[...]
    h1 = jnp.maximum(h1, 0.0)
    ff = jnp.dot(h1.astype(bf16), wf2_ref[...],
                 preferred_element_type=f32) + bf2_ref[...]

    # residual + LayerNorm2.
    x2 = x1 + ff
    mu = jnp.mean(x2, axis=-1, keepdims=True)
    var = jnp.mean(x2 * x2, axis=-1, keepdims=True) - mu * mu
    x2 = (x2 - mu) * lax.rsqrt(var + EPS) * g2_ref[...] + be2_ref[...]

    # final Linear(D, 1) on the last time step.
    out = jnp.sum(x2 * wl_ref[...], axis=-1, keepdims=True) + bl_ref[0]
    out_ref[...] = out.astype(out_ref.dtype)


def _pick_batch_block(B, L, target_rows=1024):
    """Whole batches per grid step.  BB must divide B and be a multiple of 8
    (or equal B) so the (BB, 1) output block is legal.  Candidates below B give
    >= 2 grid steps (both v7x TensorCores); target ~1024 matmul rows/step."""
    cands = [bb for bb in range(8, B, 8) if B % bb == 0 and bb * L <= target_rows]
    if cands:
        return max(cands)
    return B


def cnn_transformer_forward(x, cnn_params, tr_params, *, nhead,
                            target_rows=1024,
                            vmem_limit_bytes=64 * 1024 * 1024):
    """x: (B, Cin, L) float32 (PyTorch NCL layout).  Returns (B, 1)."""
    w1, b1, a1, w2, b2, a2 = cnn_params
    (in_proj_w, in_proj_b, wo, bo, g1, be1,
     wf1, bf1, wf2, bf2, g2, be2, wl, bl) = tr_params

    B, Cin, L = x.shape
    Cout, _, K = w1.shape
    D = Cout
    H = wf1.shape[0]
    assert Cout % Cin == 0 and D % nhead == 0

    f32, bf16 = jnp.float32, jnp.bfloat16

    # ---- host-side, one-time weight re-layouts (constant-folded under jit) ----
    # conv weights -> im2col layout (K*Cin, Cout): col[t*Cin+ci, co] = w[co, ci, t]
    w1_col = jnp.transpose(w1, (2, 1, 0)).reshape(K * Cin, Cout).astype(bf16)
    w2_col = jnp.transpose(w2, (2, 1, 0)).reshape(K * Cout, Cout).astype(bf16)
    b1_row = b1.reshape(1, Cout).astype(f32)
    b2_row = b2.reshape(1, Cout).astype(f32)
    prelu = jnp.stack([jnp.reshape(a1, ()), jnp.reshape(a2, ())]).astype(f32)

    # split the in-projection: K/V are needed for every row, Q only for the
    # last time step.
    wq_t = in_proj_w[:D].T.astype(bf16)                      # (D, D)
    bq_r = in_proj_b[:D].reshape(1, D).astype(f32)
    wkv_t = in_proj_w[D:].T.astype(bf16)                     # (D, 2D)
    bkv_r = in_proj_b[D:].reshape(1, 2 * D).astype(f32)
    wo_t = wo.T.astype(bf16)
    bo_r = bo.reshape(1, D).astype(f32)
    wf1_t = wf1.T.astype(bf16)                               # (D, H)
    bf1_r = bf1.reshape(1, H).astype(f32)
    wf2_t = wf2.T.astype(bf16)                               # (H, D)
    bf2_r = bf2.reshape(1, D).astype(f32)
    g1_r, be1_r = g1.reshape(1, D).astype(f32), be1.reshape(1, D).astype(f32)
    g2_r, be2_r = g2.reshape(1, D).astype(f32), be2.reshape(1, D).astype(f32)
    wl_r = wl.reshape(1, D).astype(f32)
    bl_s = bl.reshape(1).astype(f32)

    BB = _pick_batch_block(B, L, target_rows)
    grid = (B // BB,)

    def const_spec(shape):
        nd = len(shape)
        # constant index_map -> fetched once; single-buffered to halve the
        # resident-weight VMEM footprint (matters most on v7x / v5e).
        return pl.BlockSpec(shape, lambda i: (0,) * nd,
                            pipeline_mode=pl.Buffered(1))

    smem = pl.BlockSpec(memory_space=pltpu.MemorySpace.SMEM)

    kernel = functools.partial(_fused_kernel, nhead)
    return pl.pallas_call(
        kernel,
        out_shape=jax.ShapeDtypeStruct((B, 1), jnp.float32),
        grid=grid,
        in_specs=[
            pl.BlockSpec((BB, Cin, L), lambda i: (i, 0, 0)),        # x, native NCL
            const_spec((K * Cin, Cout)), const_spec((1, Cout)),     # conv1
            const_spec((K * Cout, Cout)), const_spec((1, Cout)),    # conv2
            smem,                                                   # PReLU slopes
            const_spec((D, D)), const_spec((1, D)),                 # Q proj (last row)
            const_spec((D, 2 * D)), const_spec((1, 2 * D)),         # fused K/V proj
            const_spec((D, D)), const_spec((1, D)),                 # attn out proj
            const_spec((1, D)), const_spec((1, D)),                 # LayerNorm1
            const_spec((D, H)), const_spec((1, H)),                 # FFN linear1
            const_spec((H, D)), const_spec((1, D)),                 # FFN linear2
            const_spec((1, D)), const_spec((1, D)),                 # LayerNorm2
            const_spec((1, D)),                                     # final linear w
            smem,                                                   # final linear b
        ],
        # (BB, 1) block: last dim equals the full dim, legal for any BB.
        out_specs=pl.BlockSpec((BB, 1), lambda i: (i, 0)),
        compiler_params=pltpu.CompilerParams(
            dimension_semantics=("parallel",),        # each step owns its rows
            vmem_limit_bytes=vmem_limit_bytes),
    )(x.astype(f32), w1_col, b1_row, w2_col, b2_row, prelu,
      wq_t, bq_r, wkv_t, bkv_r, wo_t, bo_r, g1_r, be1_r,
      wf1_t, bf1_r, wf2_t, bf2_r, g2_r, be2_r, wl_r, bl_s)


def _reference_forward(x, cnn_params, tr_params, *, nhead):
    """Pure-JAX f32 reference matching the PyTorch module (eval mode)."""
    w1, b1, a1, w2, b2, a2 = cnn_params
    (in_proj_w, in_proj_b, wo, bo, g1, be1,
     wf1, bf1, wf2, bf2, g2, be2, wl, bl) = tr_params
    B, Cin, L = x.shape
    Cout, _, K = w1.shape
    D = Cout
    hd = D // nhead
    pad_l = K // 2
    pad_r = (K - 1) - pad_l

    def inorm(t):
        m = jnp.mean(t, axis=-1, keepdims=True)
        v = jnp.mean((t - m) ** 2, axis=-1, keepdims=True)
        return (t - m) / jnp.sqrt(v + EPS)

    def conv(t, w, b):
        y = lax.conv_general_dilated(t, w, window_strides=(1,),
                                     padding=[(pad_l, pad_r)],
                                     dimension_numbers=('NCH', 'OIH', 'NCH'))
        return y + b[None, :, None]

    def lnorm(t, g, be):
        m = jnp.mean(t, axis=-1, keepdims=True)
        v = jnp.mean((t - m) ** 2, axis=-1, keepdims=True)
        return (t - m) / jnp.sqrt(v + EPS) * g + be

    xn = inorm(x)
    y = conv(xn, w1, b1)
    y = jnp.where(y >= 0, y, a1 * y)
    y = inorm(y)
    y = conv(y, w2, b2)
    y = jnp.where(y >= 0, y, a2 * y)
    y = y + jnp.tile(xn, (1, Cout // Cin, 1))
    z = jnp.transpose(y, (0, 2, 1))                  # (B, L, D)

    qkv = z @ in_proj_w.T + in_proj_b
    q, k, v = qkv[..., :D], qkv[..., D:2 * D], qkv[..., 2 * D:]
    q = q.reshape(B, L, nhead, hd)
    k = k.reshape(B, L, nhead, hd)
    v = v.reshape(B, L, nhead, hd)
    s = jnp.einsum('bqhd,bkhd->bhqk', q, k) * (hd ** -0.5)
    p = jax.nn.softmax(s, axis=-1)
    o = jnp.einsum('bhqk,bkhd->bqhd', p, v).reshape(B, L, D)
    attn = o @ wo.T + bo

    x1 = lnorm(z + attn, g1, be1)
    ff = jnp.maximum(x1 @ wf1.T + bf1, 0.0) @ wf2.T + bf2
    x2 = lnorm(x1 + ff, g2, be2)
    return x2[:, -1, :] @ wl.T + bl


if __name__ == "__main__":
    # small shapes consistent with the module
    B, Cin, L = 2, 4, 16          # batch, CNN_input_channels, seq_length
    Cout = D = 16                 # CNN_output_channels == transformer d_model
    K = 3                         # CNN kernel size
    H = 32                        # transformer dim_feedforward
    NHEAD = 2

    key = jax.random.PRNGKey(0)
    ks = jax.random.split(key, 16)
    s = 0.1

    x = jax.random.normal(ks[0], (B, Cin, L), jnp.float32)

    # CNN params in PyTorch layouts: Conv1d weight (out, in, K), bias (out,)
    w1 = jax.random.normal(ks[1], (Cout, Cin, K), jnp.float32) * s
    b1 = jax.random.normal(ks[2], (Cout,), jnp.float32) * s
    a1 = jnp.asarray(0.25, jnp.float32)          # PReLU default slope
    w2 = jax.random.normal(ks[3], (Cout, Cout, K), jnp.float32) * s
    b2 = jax.random.normal(ks[4], (Cout,), jnp.float32) * s
    a2 = jnp.asarray(0.25, jnp.float32)

    # Transformer params in PyTorch layouts (Linear weight is (out, in))
    in_proj_w = jax.random.normal(ks[5], (3 * D, D), jnp.float32) * s
    in_proj_b = jax.random.normal(ks[6], (3 * D,), jnp.float32) * s
    wo = jax.random.normal(ks[7], (D, D), jnp.float32) * s
    bo = jax.random.normal(ks[8], (D,), jnp.float32) * s
    g1 = jnp.ones((D,), jnp.float32)
    be1 = jnp.zeros((D,), jnp.float32)
    wf1 = jax.random.normal(ks[9], (H, D), jnp.float32) * s
    bf1 = jax.random.normal(ks[10], (H,), jnp.float32) * s
    wf2 = jax.random.normal(ks[11], (D, H), jnp.float32) * s
    bf2 = jax.random.normal(ks[12], (D,), jnp.float32) * s
    g2 = jnp.ones((D,), jnp.float32)
    be2 = jnp.zeros((D,), jnp.float32)
    wl = jax.random.normal(ks[13], (1, D), jnp.float32) * s
    bl = jax.random.normal(ks[14], (1,), jnp.float32) * s

    cnn_params = (w1, b1, a1, w2, b2, a2)
    tr_params = (in_proj_w, in_proj_b, wo, bo, g1, be1,
                 wf1, bf1, wf2, bf2, g2, be2, wl, bl)

    fwd = jax.jit(functools.partial(cnn_transformer_forward, nhead=NHEAD))
    out = jax.block_until_ready(fwd(x, cnn_params, tr_params))
    assert out.shape == (B, 1) and out.dtype == jnp.float32

    # loose-tolerance check vs a pure-JAX reference (the kernel uses bf16 MXU
    # operands and an approximate softmax reciprocal, so it is not bit-exact).
    ref = _reference_forward(x, cnn_params, tr_params, nhead=NHEAD)
    err = float(jnp.max(jnp.abs(out - ref)))
    assert err < 5e-2, f"max abs error {err} vs reference"

    print("KERNEL_OK")
</pallas_src>

<mosaic_0001>
module attributes {stable_mosaic.version = 11 : i64} {
  func.func @_fused_kernel(%arg0: i32, %arg1: memref<2x4x16xf32, #tpu.memory_space<vmem>>, %arg2: memref<12x16xbf16, #tpu.memory_space<vmem>>, %arg3: memref<1x16xf32, #tpu.memory_space<vmem>>, %arg4: memref<48x16xbf16, #tpu.memory_space<vmem>>, %arg5: memref<1x16xf32, #tpu.memory_space<vmem>>, %arg6: memref<2xf32, #tpu.memory_space<smem>>, %arg7: memref<16x16xbf16, #tpu.memory_space<vmem>>, %arg8: memref<1x16xf32, #tpu.memory_space<vmem>>, %arg9: memref<16x32xbf16, #tpu.memory_space<vmem>>, %arg10: memref<1x32xf32, #tpu.memory_space<vmem>>, %arg11: memref<16x16xbf16, #tpu.memory_space<vmem>>, %arg12: memref<1x16xf32, #tpu.memory_space<vmem>>, %arg13: memref<1x16xf32, #tpu.memory_space<vmem>>, %arg14: memref<1x16xf32, #tpu.memory_space<vmem>>, %arg15: memref<16x32xbf16, #tpu.memory_space<vmem>>, %arg16: memref<1x32xf32, #tpu.memory_space<vmem>>, %arg17: memref<32x16xbf16, #tpu.memory_space<vmem>>, %arg18: memref<1x16xf32, #tpu.memory_space<vmem>>, %arg19: memref<1x16xf32, #tpu.memory_space<vmem>>, %arg20: memref<1x16xf32, #tpu.memory_space<vmem>>, %arg21: memref<1x16xf32, #tpu.memory_space<vmem>>, %arg22: memref<1xf32, #tpu.memory_space<smem>>, %arg23: memref<2x1xf32, #tpu.memory_space<vmem>>) attributes {dimension_semantics = [#tpu.dimension_semantics<parallel>], iteration_bounds = array<i64: 1>, scalar_prefetch = 0 : i64, scratch_operands = 0 : i64, tpu.core_type = #tpu.core_type<tc>, window_params = [{transform_indices = @transform_0, window_bounds = array<i64: 2, 4, 16>}, {pipeline_mode = #tpu.pipeline_mode<synchronous>, transform_indices = @transform_1, window_bounds = array<i64: 12, 16>}, {pipeline_mode = #tpu.pipeline_mode<synchronous>, transform_indices = @transform_2, window_bounds = array<i64: 1, 16>}, {pipeline_mode = #tpu.pipeline_mode<synchronous>, transform_indices = @transform_3, window_bounds = array<i64: 48, 16>}, {pipeline_mode = #tpu.pipeline_mode<synchronous>, transform_indices = @transform_4, window_bounds = array<i64: 1, 16>}, {transform_indices = @transform_5, window_bounds = array<i64: 2>}, {pipeline_mode = #tpu.pipeline_mode<synchronous>, transform_indices = @transform_6, window_bounds = array<i64: 16, 16>}, {pipeline_mode = #tpu.pipeline_mode<synchronous>, transform_indices = @transform_7, window_bounds = array<i64: 1, 16>}, {pipeline_mode = #tpu.pipeline_mode<synchronous>, transform_indices = @transform_8, window_bounds = array<i64: 16, 32>}, {pipeline_mode = #tpu.pipeline_mode<synchronous>, transform_indices = @transform_9, window_bounds = array<i64: 1, 32>}, {pipeline_mode = #tpu.pipeline_mode<synchronous>, transform_indices = @transform_10, window_bounds = array<i64: 16, 16>}, {pipeline_mode = #tpu.pipeline_mode<synchronous>, transform_indices = @transform_11, window_bounds = array<i64: 1, 16>}, {pipeline_mode = #tpu.pipeline_mode<synchronous>, transform_indices = @transform_12, window_bounds = array<i64: 1, 16>}, {pipeline_mode = #tpu.pipeline_mode<synchronous>, transform_indices = @transform_13, window_bounds = array<i64: 1, 16>}, {pipeline_mode = #tpu.pipeline_mode<synchronous>, transform_indices = @transform_14, window_bounds = array<i64: 16, 32>}, {pipeline_mode = #tpu.pipeline_mode<synchronous>, transform_indices = @transform_15, window_bounds = array<i64: 1, 32>}, {pipeline_mode = #tpu.pipeline_mode<synchronous>, transform_indices = @transform_16, window_bounds = array<i64: 32, 16>}, {pipeline_mode = #tpu.pipeline_mode<synchronous>, transform_indices = @transform_17, window_bounds = array<i64: 1, 16>}, {pipeline_mode = #tpu.pipeline_mode<synchronous>, transform_indices = @transform_18, window_bounds = array<i64: 1, 16>}, {pipeline_mode = #tpu.pipeline_mode<synchronous>, transform_indices = @transform_19, window_bounds = array<i64: 1, 16>}, {pipeline_mode = #tpu.pipeline_mode<synchronous>, transform_indices = @transform_20, window_bounds = array<i64: 1, 16>}, {transform_indices = @transform_21, window_bounds = array<i64: 1>}, {transform_indices = @transform_22, window_bounds = array<i64: 2, 1>}]} {
    %c0 = arith.constant 0 : index
    %c0_0 = arith.constant 0 : index
    %c0_1 = arith.constant 0 : index
    %0 = vector.load %arg1[%c0, %c0_0, %c0_1] : memref<2x4x16xf32, #tpu.memory_space<vmem>>, vector<2x4x16xf32>
    %cst = arith.constant dense<0.000000e+00> : vector<2x4xf32>
    %1 = vector.multi_reduction <add>, %0, %cst [2] : vector<2x4x16xf32> to vector<2x4xf32>
    %2 = vector.shape_cast %1 : vector<2x4xf32> to vector<2x4x1xf32>
    %cst_2 = arith.constant 1.600000e+01 : f32
    %3 = vector.broadcast %cst_2 : f32 to vector<2x4x1xf32>
    %4 = arith.divf %2, %3 : vector<2x4x1xf32>
    %5 = arith.mulf %0, %0 : vector<2x4x16xf32>
    %cst_3 = arith.constant dense<0.000000e+00> : vector<2x4xf32>
    %6 = vector.multi_reduction <add>, %5, %cst_3 [2] : vector<2x4x16xf32> to vector<2x4xf32>
    %7 = vector.shape_cast %6 : vector<2x4xf32> to vector<2x4x1xf32>
    %cst_4 = arith.constant 1.600000e+01 : f32
    %8 = vector.broadcast %cst_4 : f32 to vector<2x4x1xf32>
    %9 = arith.divf %7, %8 : vector<2x4x1xf32>
    %10 = arith.mulf %4, %4 : vector<2x4x1xf32>
    %11 = arith.subf %9, %10 : vector<2x4x1xf32>
    %12 = vector.broadcast %4 : vector<2x4x1xf32> to vector<2x4x16xf32>
    %13 = arith.subf %0, %12 : vector<2x4x16xf32>
    %cst_5 = arith.constant 9.99999974E-6 : f32
    %14 = vector.broadcast %cst_5 : f32 to vector<2x4x1xf32>
    %15 = arith.addf %11, %14 : vector<2x4x1xf32>
    %16 = math.rsqrt %15 : vector<2x4x1xf32>
    %17 = vector.broadcast %16 : vector<2x4x1xf32> to vector<2x4x16xf32>
    %18 = arith.mulf %13, %17 : vector<2x4x16xf32>
    %19 = tpu.transpose %18, [0, 2, 1] : vector<2x4x16xf32> -> vector<2x16x4xf32>
    %20 = tpu.iota {dimensions = array<i32: 0>} : vector<16x1xi32>
    %c1_i32 = arith.constant 1 : i32
    %21 = tpu.dynamic_rotate %19 by %c1_i32 dim 1 : vector<2x16x4xf32>, i32 -> vector<2x16x4xf32>
    %c-1_i32 = arith.constant -1 : i32
    %22 = vector.broadcast %c-1_i32 : i32 to vector<16x1xi32>
    %23 = arith.addi %20, %22 : vector<16x1xi32>
    %c0_i32 = arith.constant 0 : i32
    %24 = vector.broadcast %c0_i32 : i32 to vector<16x1xi32>
    %25 = arith.cmpi sge, %23, %24 : vector<16x1xi32>
    %c-1_i32_6 = arith.constant -1 : i32
    %26 = vector.broadcast %c-1_i32_6 : i32 to vector<16x1xi32>
    %27 = arith.addi %20, %26 : vector<16x1xi32>
    %c16_i32 = arith.constant 16 : i32
    %28 = vector.broadcast %c16_i32 : i32 to vector<16x1xi32>
    %29 = arith.cmpi slt, %27, %28 : vector<16x1xi32>
    %30 = arith.andi %25, %29 : vector<16x1xi1>
    %cst_7 = arith.constant 0.000000e+00 : f32
    %31 = vector.shape_cast %30 : vector<16x1xi1> to vector<1x16x1xi1>
    %32 = vector.broadcast %31 : vector<1x16x1xi1> to vector<2x16x4xi1>
    %33 = vector.broadcast %cst_7 : f32 to vector<2x16x4xf32>
    %34 = arith.select %32, %21, %33 : vector<2x16x4xi1>, vector<2x16x4xf32>
    %c15_i32 = arith.constant 15 : i32
    %35 = tpu.dynamic_rotate %19 by %c15_i32 dim 1 : vector<2x16x4xf32>, i32 -> vector<2x16x4xf32>
    %c1_i32_8 = arith.constant 1 : i32
    %36 = vector.broadcast %c1_i32_8 : i32 to vector<16x1xi32>
    %37 = arith.addi %20, %36 : vector<16x1xi32>
    %c0_i32_9 = arith.constant 0 : i32
    %38 = vector.broadcast %c0_i32_9 : i32 to vector<16x1xi32>
    %39 = arith.cmpi sge, %37, %38 : vector<16x1xi32>
    %c1_i32_10 = arith.constant 1 : i32
    %40 = vector.broadcast %c1_i32_10 : i32 to vector<16x1xi32>
    %41 = arith.addi %20, %40 : vector<16x1xi32>
    %c16_i32_11 = arith.constant 16 : i32
    %42 = vector.broadcast %c16_i32_11 : i32 to vector<16x1xi32>
    %43 = arith.cmpi slt, %41, %42 : vector<16x1xi32>
    %44 = arith.andi %39, %43 : vector<16x1xi1>
    %cst_12 = arith.constant 0.000000e+00 : f32
    %45 = vector.shape_cast %44 : vector<16x1xi1> to vector<1x16x1xi1>
    %46 = vector.broadcast %45 : vector<1x16x1xi1> to vector<2x16x4xi1>
    %47 = vector.broadcast %cst_12 : f32 to vector<2x16x4xf32>
    %48 = arith.select %46, %35, %47 : vector<2x16x4xi1>, vector<2x16x4xf32>
    %49 = tpu.concatenate %34, %19, %48 in 2 : vector<2x16x4xf32>, vector<2x16x4xf32>, vector<2x16x4xf32> -> vector<2x16x12xf32>
    %50 = vector.shape_cast %49 : vector<2x16x12xf32> to vector<32x12xf32>
    %51 = arith.truncf %50 : vector<32x12xf32> to vector<32x12xbf16>
    %c0_13 = arith.constant 0 : index
    %c0_14 = arith.constant 0 : index
    %52 = vector.load %arg2[%c0_13, %c0_14] : memref<12x16xbf16, #tpu.memory_space<vmem>>, vector<12x16xbf16>
    %cst_15 = arith.constant dense<0.000000e+00> : vector<32x16xf32>
    %53 = tpu.matmul %51, %52, %cst_15 {dimension_numbers = #tpu.dot_dimension_numbers<[1], [0], [0], [1], [0, 0, 1, 1], [], []>} : vector<32x12xbf16>, vector<12x16xbf16>, vector<32x16xf32> -> vector<32x16xf32>
    %c0_16 = arith.constant 0 : index
    %c0_17 = arith.constant 0 : index
    %54 = vector.load %arg3[%c0_16, %c0_17] : memref<1x16xf32, #tpu.memory_space<vmem>>, vector<1x16xf32>
    %55 = vector.broadcast %54 : vector<1x16xf32> to vector<32x16xf32>
    %56 = arith.addf %53, %55 : vector<32x16xf32>
    %cst_18 = arith.constant 0.000000e+00 : f32
    %57 = vector.broadcast %cst_18 : f32 to vector<32x16xf32>
    %58 = arith.cmpf oge, %56, %57 : vector<32x16xf32>
    %c0_19 = arith.constant 0 : index
    %59 = memref.load %arg6[%c0_19] : memref<2xf32, #tpu.memory_space<smem>>
    %60 = vector.broadcast %59 : f32 to vector<32x16xf32>
    %61 = arith.mulf %60, %56 : vector<32x16xf32>
    %62 = arith.select %58, %56, %61 : vector<32x16xi1>, vector<32x16xf32>
    %63 = vector.shape_cast %62 : vector<32x16xf32> to vector<2x16x16xf32>
    %cst_20 = arith.constant dense<0.000000e+00> : vector<2x16xf32>
    %64 = vector.multi_reduction <add>, %63, %cst_20 [1] : vector<2x16x16xf32> to vector<2x16xf32>
    %65 = vector.shape_cast %64 : vector<2x16xf32> to vector<2x1x16xf32>
    %cst_21 = arith.constant 1.600000e+01 : f32
    %66 = vector.broadcast %cst_21 : f32 to vector<2x1x16xf32>
    %67 = arith.divf %65, %66 : vector<2x1x16xf32>
    %68 = arith.mulf %63, %63 : vector<2x16x16xf32>
    %cst_22 = arith.constant dense<0.000000e+00> : vector<2x16xf32>
    %69 = vector.multi_reduction <add>, %68, %cst_22 [1] : vector<2x16x16xf32> to vector<2x16xf32>
    %70 = vector.shape_cast %69 : vector<2x16xf32> to vector<2x1x16xf32>
    %cst_23 = arith.constant 1.600000e+01 : f32
    %71 = vector.broadcast %cst_23 : f32 to vector<2x1x16xf32>
    %72 = arith.divf %70, %71 : vector<2x1x16xf32>
    %73 = arith.mulf %67, %67 : vector<2x1x16xf32>
    %74 = arith.subf %72, %73 : vector<2x1x16xf32>
    %75 = vector.broadcast %67 : vector<2x1x16xf32> to vector<2x16x16xf32>
    %76 = arith.subf %63, %75 : vector<2x16x16xf32>
    %cst_24 = arith.constant 9.99999974E-6 : f32
    %77 = vector.broadcast %cst_24 : f32 to vector<2x1x16xf32>
    %78 = arith.addf %74, %77 : vector<2x1x16xf32>
    %79 = math.rsqrt %78 : vector<2x1x16xf32>
    %80 = vector.broadcast %79 : vector<2x1x16xf32> to vector<2x16x16xf32>
    %81 = arith.mulf %76, %80 : vector<2x16x16xf32>
    %82 = tpu.iota {dimensions = array<i32: 0>} : vector<16x1xi32>
    %c1_i32_25 = arith.constant 1 : i32
    %83 = tpu.dynamic_rotate %81 by %c1_i32_25 dim 1 : vector<2x16x16xf32>, i32 -> vector<2x16x16xf32>
    %c-1_i32_26 = arith.constant -1 : i32
    %84 = vector.broadcast %c-1_i32_26 : i32 to vector<16x1xi32>
    %85 = arith.addi %82, %84 : vector<16x1xi32>
    %c0_i32_27 = arith.constant 0 : i32
    %86 = vector.broadcast %c0_i32_27 : i32 to vector<16x1xi32>
    %87 = arith.cmpi sge, %85, %86 : vector<16x1xi32>
    %c-1_i32_28 = arith.constant -1 : i32
    %88 = vector.broadcast %c-1_i32_28 : i32 to vector<16x1xi32>
    %89 = arith.addi %82, %88 : vector<16x1xi32>
    %c16_i32_29 = arith.constant 16 : i32
    %90 = vector.broadcast %c16_i32_29 : i32 to vector<16x1xi32>
    %91 = arith.cmpi slt, %89, %90 : vector<16x1xi32>
    %92 = arith.andi %87, %91 : vector<16x1xi1>
    %cst_30 = arith.constant 0.000000e+00 : f32
    %93 = vector.shape_cast %92 : vector<16x1xi1> to vector<1x16x1xi1>
    %94 = vector.broadcast %93 : vector<1x16x1xi1> to vector<2x16x16xi1>
    %95 = vector.broadcast %cst_30 : f32 to vector<2x16x16xf32>
    %96 = arith.select %94, %83, %95 : vector<2x16x16xi1>, vector<2x16x16xf32>
    %c15_i32_31 = arith.constant 15 : i32
    %97 = tpu.dynamic_rotate %81 by %c15_i32_31 dim 1 : vector<2x16x16xf32>, i32 -> vector<2x16x16xf32>
    %c1_i32_32 = arith.constant 1 : i32
    %98 = vector.broadcast %c1_i32_32 : i32 to vector<16x1xi32>
    %99 = arith.addi %82, %98 : vector<16x1xi32>
    %c0_i32_33 = arith.constant 0 : i32
    %100 = vector.broadcast %c0_i32_33 : i32 to vector<16x1xi32>
    %101 = arith.cmpi sge, %99, %100 : vector<16x1xi32>
    %c1_i32_34 = arith.constant 1 : i32
    %102 = vector.broadcast %c1_i32_34 : i32 to vector<16x1xi32>
    %103 = arith.addi %82, %102 : vector<16x1xi32>
    %c16_i32_35 = arith.constant 16 : i32
    %104 = vector.broadcast %c16_i32_35 : i32 to vector<16x1xi32>
    %105 = arith.cmpi slt, %103, %104 : vector<16x1xi32>
    %106 = arith.andi %101, %105 : vector<16x1xi1>
    %cst_36 = arith.constant 0.000000e+00 : f32
    %107 = vector.shape_cast %106 : vector<16x1xi1> to vector<1x16x1xi1>
    %108 = vector.broadcast %107 : vector<1x16x1xi1> to vector<2x16x16xi1>
    %109 = vector.broadcast %cst_36 : f32 to vector<2x16x16xf32>
    %110 = arith.select %108, %97, %109 : vector<2x16x16xi1>, vector<2x16x16xf32>
    %111 = tpu.concatenate %96, %81, %110 in 2 : vector<2x16x16xf32>, vector<2x16x16xf32>, vector<2x16x16xf32> -> vector<2x16x48xf32>
    %112 = vector.shape_cast %111 : vector<2x16x48xf32> to vector<32x48xf32>
    %113 = arith.truncf %112 : vector<32x48xf32> to vector<32x48xbf16>
    %c0_37 = arith.constant 0 : index
    %c0_38 = arith.constant 0 : index
    %114 = vector.load %arg4[%c0_37, %c0_38] : memref<48x16xbf16, #tpu.memory_space<vmem>>, vector<48x16xbf16>
    %cst_39 = arith.constant dense<0.000000e+00> : vector<32x16xf32>
    %115 = tpu.matmul %113, %114, %cst_39 {dimension_numbers = #tpu.dot_dimension_numbers<[1], [0], [0], [1], [0, 0, 1, 1], [], []>} : vector<32x48xbf16>, vector<48x16xbf16>, vector<32x16xf32> -> vector<32x16xf32>
    %c0_40 = arith.constant 0 : index
    %c0_41 = arith.constant 0 : index
    %116 = vector.load %arg5[%c0_40, %c0_41] : memref<1x16xf32, #tpu.memory_space<vmem>>, vector<1x16xf32>
    %117 = vector.broadcast %116 : vector<1x16xf32> to vector<32x16xf32>
    %118 = arith.addf %115, %117 : vector<32x16xf32>
    %cst_42 = arith.constant 0.000000e+00 : f32
    %119 = vector.broadcast %cst_42 : f32 to vector<32x16xf32>
    %120 = arith.cmpf oge, %118, %119 : vector<32x16xf32>
    %c1 = arith.constant 1 : index
    %121 = memref.load %arg6[%c1] : memref<2xf32, #tpu.memory_space<smem>>
    %122 = vector.broadcast %121 : f32 to vector<32x16xf32>
    %123 = arith.mulf %122, %118 : vector<32x16xf32>
    %124 = arith.select %120, %118, %123 : vector<32x16xi1>, vector<32x16xf32>
    %125 = tpu.concatenate %19, %19, %19, %19 in 2 : vector<2x16x4xf32>, vector<2x16x4xf32>, vector<2x16x4xf32>, vector<2x16x4xf32> -> vector<2x16x16xf32>
    %126 = vector.shape_cast %125 : vector<2x16x16xf32> to vector<32x16xf32>
    %127 = arith.addf %124, %126 : vector<32x16xf32>
    %128 = arith.truncf %127 : vector<32x16xf32> to vector<32x16xbf16>
    %c0_43 = arith.constant 0 : index
    %c0_44 = arith.constant 0 : index
    %129 = vector.load %arg9[%c0_43, %c0_44] : memref<16x32xbf16, #tpu.memory_space<vmem>>, vector<16x32xbf16>
    %cst_45 = arith.constant dense<0.000000e+00> : vector<32x32xf32>
    %130 = tpu.matmul %128, %129, %cst_45 {dimension_numbers = #tpu.dot_dimension_numbers<[1], [0], [0], [1], [0, 0, 1, 1], [], []>} : vector<32x16xbf16>, vector<16x32xbf16>, vector<32x32xf32> -> vector<32x32xf32>
    %c0_46 = arith.constant 0 : index
    %c0_47 = arith.constant 0 : index
    %131 = vector.load %arg10[%c0_46, %c0_47] : memref<1x32xf32, #tpu.memory_space<vmem>>, vector<1x32xf32>
    %132 = vector.broadcast %131 : vector<1x32xf32> to vector<32x32xf32>
    %133 = arith.addf %130, %132 : vector<32x32xf32>
    %134 = vector.shape_cast %133 : vector<32x32xf32> to vector<2x16x32xf32>
    %135 = arith.truncf %134 : vector<2x16x32xf32> to vector<2x16x32xbf16>
    %136 = vector.shape_cast %127 : vector<32x16xf32> to vector<2x16x16xf32>
    %137 = vector.extract_strided_slice %136 {offsets = [0, 15, 0], sizes = [2, 1, 16], strides = [1, 1, 1]} : vector<2x16x16xf32> to vector<2x1x16xf32>
    %138 = vector.shape_cast %137 : vector<2x1x16xf32> to vector<2x16xf32>
    %139 = arith.truncf %138 : vector<2x16xf32> to vector<2x16xbf16>
    %c0_48 = arith.constant 0 : index
    %c0_49 = arith.constant 0 : index
    %140 = vector.load %arg7[%c0_48, %c0_49] : memref<16x16xbf16, #tpu.memory_space<vmem>>, vector<16x16xbf16>
    %cst_50 = arith.constant dense<0.000000e+00> : vector<2x16xf32>
    %141 = tpu.matmul %139, %140, %cst_50 {dimension_numbers = #tpu.dot_dimension_numbers<[1], [0], [0], [1], [0, 0, 1, 1], [], []>} : vector<2x16xbf16>, vector<16x16xbf16>, vector<2x16xf32> -> vector<2x16xf32>
    %c0_51 = arith.constant 0 : index
    %c0_52 = arith.constant 0 : index
    %142 = vector.load %arg8[%c0_51, %c0_52] : memref<1x16xf32, #tpu.memory_space<vmem>>, vector<1x16xf32>
    %143 = vector.broadcast %142 : vector<1x16xf32> to vector<2x16xf32>
    %144 = arith.addf %141, %143 : vector<2x16xf32>
    %145 = vector.shape_cast %144 : vector<2x16xf32> to vector<2x1x16xf32>
    %146 = arith.truncf %145 : vector<2x1x16xf32> to vector<2x1x16xbf16>
    %147 = vector.extract_strided_slice %146 {offsets = [0, 0, 0], sizes = [2, 1, 8], strides = [1, 1, 1]} : vector<2x1x16xbf16> to vector<2x1x8xbf16>
    %148 = vector.extract_strided_slice %135 {offsets = [0, 0, 0], sizes = [2, 16, 8], strides = [1, 1, 1]} : vector<2x16x32xbf16> to vector<2x16x8xbf16>
    %149 = vector.extract_strided_slice %135 {offsets = [0, 0, 16], sizes = [2, 16, 8], strides = [1, 1, 1]} : vector<2x16x32xbf16> to vector<2x16x8xbf16>
    "tpu.trace_start"() <{level = 10 : i32, message = "bqd,bkd->bqk"}> : () -> ()
    %cst_53 = arith.constant dense<0.000000e+00> : vector<2x1x16xf32>
    %150 = tpu.matmul %147, %148, %cst_53 {dimension_numbers = #tpu.dot_dimension_numbers<[2], [2], [1], [1], [0, 0, 0, 1, 1, 1], [0], [0]>} : vector<2x1x8xbf16>, vector<2x16x8xbf16>, vector<2x1x16xf32> -> vector<2x1x16xf32>
    "tpu.trace_stop"() : () -> ()
    %cst_54 = arith.constant 0.353553385 : f32
    %151 = vector.broadcast %cst_54 : f32 to vector<2x1x16xf32>
    %152 = arith.mulf %150, %151 : vector<2x1x16xf32>
    %cst_55 = arith.constant dense<0xFF800000> : vector<2x1xf32>
    %153 = vector.multi_reduction <maximumf>, %152, %cst_55 [2] : vector<2x1x16xf32> to vector<2x1xf32>
    %154 = vector.shape_cast %153 : vector<2x1xf32> to vector<2x1x1xf32>
    %155 = vector.broadcast %154 : vector<2x1x1xf32> to vector<2x1x16xf32>
    %156 = arith.subf %152, %155 : vector<2x1x16xf32>
    %157 = math.exp %156 : vector<2x1x16xf32>
    %cst_56 = arith.constant dense<0.000000e+00> : vector<2x1xf32>
    %158 = vector.multi_reduction <add>, %157, %cst_56 [2] : vector<2x1x16xf32> to vector<2x1xf32>
    %159 = vector.shape_cast %158 : vector<2x1xf32> to vector<2x1x1xf32>
    %160 = tpu.reciprocal %159 {approx = true} : vector<2x1x1xf32> -> vector<2x1x1xf32>
    %161 = vector.broadcast %160 : vector<2x1x1xf32> to vector<2x1x16xf32>
    %162 = arith.mulf %157, %161 : vector<2x1x16xf32>
    %163 = arith.truncf %162 : vector<2x1x16xf32> to vector<2x1x16xbf16>
    "tpu.trace_start"() <{level = 10 : i32, message = "bqk,bkd->bqd"}> : () -> ()
    %cst_57 = arith.constant dense<0.000000e+00> : vector<2x1x8xf32>
    %164 = tpu.matmul %163, %149, %cst_57 {dimension_numbers = #tpu.dot_dimension_numbers<[2], [1], [1], [2], [0, 0, 0, 1, 1, 2], [0], [0]>} : vector<2x1x16xbf16>, vector<2x16x8xbf16>, vector<2x1x8xf32> -> vector<2x1x8xf32>
    "tpu.trace_stop"() : () -> ()
    %165 = vector.extract_strided_slice %146 {offsets = [0, 0, 8], sizes = [2, 1, 8], strides = [1, 1, 1]} : vector<2x1x16xbf16> to vector<2x1x8xbf16>
    %166 = vector.extract_strided_slice %135 {offsets = [0, 0, 8], sizes = [2, 16, 8], strides = [1, 1, 1]} : vector<2x16x32xbf16> to vector<2x16x8xbf16>
    %167 = vector.extract_strided_slice %135 {offsets = [0, 0, 24], sizes = [2, 16, 8], strides = [1, 1, 1]} : vector<2x16x32xbf16> to vector<2x16x8xbf16>
    "tpu.trace_start"() <{level = 10 : i32, message = "bqd,bkd->bqk"}> : () -> ()
    %cst_58 = arith.constant dense<0.000000e+00> : vector<2x1x16xf32>
    %168 = tpu.matmul %165, %166, %cst_58 {dimension_numbers = #tpu.dot_dimension_numbers<[2], [2], [1], [1], [0, 0, 0, 1, 1, 1], [0], [0]>} : vector<2x1x8xbf16>, vector<2x16x8xbf16>, vector<2x1x16xf32> -> vector<2x1x16xf32>
    "tpu.trace_stop"() : () -> ()
    %cst_59 = arith.constant 0.353553385 : f32
    %169 = vector.broadcast %cst_59 : f32 to vector<2x1x16xf32>
    %170 = arith.mulf %168, %169 : vector<2x1x16xf32>
    %cst_60 = arith.constant dense<0xFF800000> : vector<2x1xf32>
    %171 = vector.multi_reduction <maximumf>, %170, %cst_60 [2] : vector<2x1x16xf32> to vector<2x1xf32>
    %172 = vector.shape_cast %171 : vector<2x1xf32> to vector<2x1x1xf32>
    %173 = vector.broadcast %172 : vector<2x1x1xf32> to vector<2x1x16xf32>
    %174 = arith.subf %170, %173 : vector<2x1x16xf32>
    %175 = math.exp %174 : vector<2x1x16xf32>
    %cst_61 = arith.constant dense<0.000000e+00> : vector<2x1xf32>
    %176 = vector.multi_reduction <add>, %175, %cst_61 [2] : vector<2x1x16xf32> to vector<2x1xf32>
    %177 = vector.shape_cast %176 : vector<2x1xf32> to vector<2x1x1xf32>
    %178 = tpu.reciprocal %177 {approx = true} : vector<2x1x1xf32> -> vector<2x1x1xf32>
    %179 = vector.broadcast %178 : vector<2x1x1xf32> to vector<2x1x16xf32>
    %180 = arith.mulf %175, %179 : vector<2x1x16xf32>
    %181 = arith.truncf %180 : vector<2x1x16xf32> to vector<2x1x16xbf16>
    "tpu.trace_start"() <{level = 10 : i32, message = "bqk,bkd->bqd"}> : () -> ()
    %cst_62 = arith.constant dense<0.000000e+00> : vector<2x1x8xf32>
    %182 = tpu.matmul %181, %167, %cst_62 {dimension_numbers = #tpu.dot_dimension_numbers<[2], [1], [1], [2], [0, 0, 0, 1, 1, 2], [0], [0]>} : vector<2x1x16xbf16>, vector<2x16x8xbf16>, vector<2x1x8xf32> -> vector<2x1x8xf32>
    "tpu.trace_stop"() : () -> ()
    %183 = tpu.concatenate %164, %182 in 2 : vector<2x1x8xf32>, vector<2x1x8xf32> -> vector<2x1x16xf32>
    %184 = vector.shape_cast %183 : vector<2x1x16xf32> to vector<2x16xf32>
    %185 = arith.truncf %184 : vector<2x16xf32> to vector<2x16xbf16>
    %c0_63 = arith.constant 0 : index
    %c0_64 = arith.constant 0 : index
    %186 = vector.load %arg11[%c0_63, %c0_64] : memref<16x16xbf16, #tpu.memory_space<vmem>>, vector<16x16xbf16>
    %cst_65 = arith.constant dense<0.000000e+00> : vector<2x16xf32>
    %187 = tpu.matmul %185, %186, %cst_65 {dimension_numbers = #tpu.dot_dimension_numbers<[1], [0], [0], [1], [0, 0, 1, 1], [], []>} : vector<2x16xbf16>, vector<16x16xbf16>, vector<2x16xf32> -> vector<2x16xf32>
    %c0_66 = arith.constant 0 : index
    %c0_67 = arith.constant 0 : index
    %188 = vector.load %arg12[%c0_66, %c0_67] : memref<1x16xf32, #tpu.memory_space<vmem>>, vector<1x16xf32>
    %189 = vector.broadcast %188 : vector<1x16xf32> to vector<2x16xf32>
    %190 = arith.addf %187, %189 : vector<2x16xf32>
    %191 = arith.addf %138, %190 : vector<2x16xf32>
    %cst_68 = arith.constant dense<0.000000e+00> : vector<2xf32>
    %192 = vector.multi_reduction <add>, %191, %cst_68 [1] : vector<2x16xf32> to vector<2xf32>
    %193 = vector.shape_cast %192 : vector<2xf32> to vector<2x1xf32>
    %cst_69 = arith.constant 1.600000e+01 : f32
    %194 = vector.broadcast %cst_69 : f32 to vector<2x1xf32>
    %195 = arith.divf %193, %194 : vector<2x1xf32>
    %196 = arith.mulf %191, %191 : vector<2x16xf32>
    %cst_70 = arith.constant dense<0.000000e+00> : vector<2xf32>
    %197 = vector.multi_reduction <add>, %196, %cst_70 [1] : vector<2x16xf32> to vector<2xf32>
    %198 = vector.shape_cast %197 : vector<2xf32> to vector<2x1xf32>
    %cst_71 = arith.constant 1.600000e+01 : f32
    %199 = vector.broadcast %cst_71 : f32 to vector<2x1xf32>
    %200 = arith.divf %198, %199 : vector<2x1xf32>
    %201 = arith.mulf %195, %195 : vector<2x1xf32>
    %202 = arith.subf %200, %201 : vector<2x1xf32>
    %203 = vector.broadcast %195 : vector<2x1xf32> to vector<2x16xf32>
    %204 = arith.subf %191, %203 : vector<2x16xf32>
    %cst_72 = arith.constant 9.99999974E-6 : f32
    %205 = vector.broadcast %cst_72 : f32 to vector<2x1xf32>
    %206 = arith.addf %202, %205 : vector<2x1xf32>
    %207 = math.rsqrt %206 : vector<2x1xf32>
    %208 = vector.broadcast %207 : vector<2x1xf32> to vector<2x16xf32>
    %209 = arith.mulf %204, %208 : vector<2x16xf32>
    %c0_73 = arith.constant 0 : index
    %c0_74 = arith.constant 0 : index
    %210 = vector.load %arg13[%c0_73, %c0_74] : memref<1x16xf32, #tpu.memory_space<vmem>>, vector<1x16xf32>
    %211 = vector.broadcast %210 : vector<1x16xf32> to vector<2x16xf32>
    %212 = arith.mulf %209, %211 : vector<2x16xf32>
    %c0_75 = arith.constant 0 : index
    %c0_76 = arith.constant 0 : index
    %213 = vector.load %arg14[%c0_75, %c0_76] : memref<1x16xf32, #tpu.memory_space<vmem>>, vector<1x16xf32>
    %214 = vector.broadcast %213 : vector<1x16xf32> to vector<2x16xf32>
    %215 = arith.addf %212, %214 : vector<2x16xf32>
    %216 = arith.truncf %215 : vector<2x16xf32> to vector<2x16xbf16>
    %c0_77 = arith.constant 0 : index
    %c0_78 = arith.constant 0 : index
    %217 = vector.load %arg15[%c0_77, %c0_78] : memref<16x32xbf16, #tpu.memory_space<vmem>>, vector<16x32xbf16>
    %cst_79 = arith.constant dense<0.000000e+00> : vector<2x32xf32>
    %218 = tpu.matmul %216, %217, %cst_79 {dimension_numbers = #tpu.dot_dimension_numbers<[1], [0], [0], [1], [0, 0, 1, 1], [], []>} : vector<2x16xbf16>, vector<16x32xbf16>, vector<2x32xf32> -> vector<2x32xf32>
    %c0_80 = arith.constant 0 : index
    %c0_81 = arith.constant 0 : index
    %219 = vector.load %arg16[%c0_80, %c0_81] : memref<1x32xf32, #tpu.memory_space<vmem>>, vector<1x32xf32>
    %220 = vector.broadcast %219 : vector<1x32xf32> to vector<2x32xf32>
    %221 = arith.addf %218, %220 : vector<2x32xf32>
    %cst_82 = arith.constant 0.000000e+00 : f32
    %222 = vector.broadcast %cst_82 : f32 to vector<2x32xf32>
    %223 = arith.maximumf %221, %222 : vector<2x32xf32>
    %224 = arith.truncf %223 : vector<2x32xf32> to vector<2x32xbf16>
    %c0_83 = arith.constant 0 : index
    %c0_84 = arith.constant 0 : index
    %225 = vector.load %arg17[%c0_83, %c0_84] : memref<32x16xbf16, #tpu.memory_space<vmem>>, vector<32x16xbf16>
    %cst_85 = arith.constant dense<0.000000e+00> : vector<2x16xf32>
    %226 = tpu.matmul %224, %225, %cst_85 {dimension_numbers = #tpu.dot_dimension_numbers<[1], [0], [0], [1], [0, 0, 1, 1], [], []>} : vector<2x32xbf16>, vector<32x16xbf16>, vector<2x16xf32> -> vector<2x16xf32>
    %c0_86 = arith.constant 0 : index
    %c0_87 = arith.constant 0 : index
    %227 = vector.load %arg18[%c0_86, %c0_87] : memref<1x16xf32, #tpu.memory_space<vmem>>, vector<1x16xf32>
    %228 = vector.broadcast %227 : vector<1x16xf32> to vector<2x16xf32>
    %229 = arith.addf %226, %228 : vector<2x16xf32>
    %230 = arith.addf %215, %229 : vector<2x16xf32>
    %cst_88 = arith.constant dense<0.000000e+00> : vector<2xf32>
    %231 = vector.multi_reduction <add>, %230, %cst_88 [1] : vector<2x16xf32> to vector<2xf32>
    %232 = vector.shape_cast %231 : vector<2xf32> to vector<2x1xf32>
    %cst_89 = arith.constant 1.600000e+01 : f32
    %233 = vector.broadcast %cst_89 : f32 to vector<2x1xf32>
    %234 = arith.divf %232, %233 : vector<2x1xf32>
    %235 = arith.mulf %230, %230 : vector<2x16xf32>
    %cst_90 = arith.constant dense<0.000000e+00> : vector<2xf32>
    %236 = vector.multi_reduction <add>, %235, %cst_90 [1] : vector<2x16xf32> to vector<2xf32>
    %237 = vector.shape_cast %236 : vector<2xf32> to vector<2x1xf32>
    %cst_91 = arith.constant 1.600000e+01 : f32
    %238 = vector.broadcast %cst_91 : f32 to vector<2x1xf32>
    %239 = arith.divf %237, %238 : vector<2x1xf32>
    %240 = arith.mulf %234, %234 : vector<2x1xf32>
    %241 = arith.subf %239, %240 : vector<2x1xf32>
    %242 = vector.broadcast %234 : vector<2x1xf32> to vector<2x16xf32>
    %243 = arith.subf %230, %242 : vector<2x16xf32>
    %cst_92 = arith.constant 9.99999974E-6 : f32
    %244 = vector.broadcast %cst_92 : f32 to vector<2x1xf32>
    %245 = arith.addf %241, %244 : vector<2x1xf32>
    %246 = math.rsqrt %245 : vector<2x1xf32>
    %247 = vector.broadcast %246 : vector<2x1xf32> to vector<2x16xf32>
    %248 = arith.mulf %243, %247 : vector<2x16xf32>
    %c0_93 = arith.constant 0 : index
    %c0_94 = arith.constant 0 : index
    %249 = vector.load %arg19[%c0_93, %c0_94] : memref<1x16xf32, #tpu.memory_space<vmem>>, vector<1x16xf32>
    %250 = vector.broadcast %249 : vector<1x16xf32> to vector<2x16xf32>
    %251 = arith.mulf %248, %250 : vector<2x16xf32>
    %c0_95 = arith.constant 0 : index
    %c0_96 = arith.constant 0 : index
    %252 = vector.load %arg20[%c0_95, %c0_96] : memref<1x16xf32, #tpu.memory_space<vmem>>, vector<1x16xf32>
    %253 = vector.broadcast %252 : vector<1x16xf32> to vector<2x16xf32>
    %254 = arith.addf %251, %253 : vector<2x16xf32>
    %c0_97 = arith.constant 0 : index
    %c0_98 = arith.constant 0 : index
    %255 = vector.load %arg21[%c0_97, %c0_98] : memref<1x16xf32, #tpu.memory_space<vmem>>, vector<1x16xf32>
    %256 = vector.broadcast %255 : vector<1x16xf32> to vector<2x16xf32>
    %257 = arith.mulf %254, %256 : vector<2x16xf32>
    %cst_99 = arith.constant dense<0.000000e+00> : vector<2xf32>
    %258 = vector.multi_reduction <add>, %257, %cst_99 [1] : vector<2x16xf32> to vector<2xf32>
    %259 = vector.shape_cast %258 : vector<2xf32> to vector<2x1xf32>
    %c0_100 = arith.constant 0 : index
    %260 = memref.load %arg22[%c0_100] : memref<1xf32, #tpu.memory_space<smem>>
    %261 = vector.broadcast %260 : f32 to vector<2x1xf32>
    %262 = arith.addf %259, %261 : vector<2x1xf32>
    %c0_101 = arith.constant 0 : index
    %c0_102 = arith.constant 0 : index
    %263 = vector.load %arg23[%c0_101, %c0_102] : memref<2x1xf32, #tpu.memory_space<vmem>>, vector<2x1xf32>
    tpu.vector_store %arg23[%c0_101, %c0_102], %262 {strides = array<i32>} : memref<2x1xf32, #tpu.memory_space<vmem>>, vector<2x1xf32>,
    return
  }
  func.func @transform_0(%arg0: i32) -> (i32, i32, i32) {
    %c0_i32 = arith.constant 0 : i32
    %c0_i32_0 = arith.constant 0 : i32
    %c0_i32_1 = arith.constant 0 : i32
    return %arg0, %c0_i32, %c0_i32_0 : i32, i32, i32
  }
  func.func @transform_1(%arg0: i32) -> (i32, i32) {
    %c0_i32 = arith.constant 0 : i32
    %c0_i32_0 = arith.constant 0 : i32
    %c0_i32_1 = arith.constant 0 : i32
    return %c0_i32, %c0_i32_0 : i32, i32
  }
  func.func @transform_2(%arg0: i32) -> (i32, i32) {
    %c0_i32 = arith.constant 0 : i32
    %c0_i32_0 = arith.constant 0 : i32
    %c0_i32_1 = arith.constant 0 : i32
    return %c0_i32, %c0_i32_0 : i32, i32
  }
  func.func @transform_3(%arg0: i32) -> (i32, i32) {
    %c0_i32 = arith.constant 0 : i32
    %c0_i32_0 = arith.constant 0 : i32
    %c0_i32_1 = arith.constant 0 : i32
    return %c0_i32, %c0_i32_0 : i32, i32
  }
  func.func @transform_4(%arg0: i32) -> (i32, i32) {
    %c0_i32 = arith.constant 0 : i32
    %c0_i32_0 = arith.constant 0 : i32
    %c0_i32_1 = arith.constant 0 : i32
    return %c0_i32, %c0_i32_0 : i32, i32
  }
  func.func @transform_5(%arg0: i32) -> i32 {
    %c0_i32 = arith.constant 0 : i32
    %c0_i32_0 = arith.constant 0 : i32
    return %c0_i32 : i32
  }
  func.func @transform_6(%arg0: i32) -> (i32, i32) {
    %c0_i32 = arith.constant 0 : i32
    %c0_i32_0 = arith.constant 0 : i32
    %c0_i32_1 = arith.constant 0 : i32
    return %c0_i32, %c0_i32_0 : i32, i32
  }
  func.func @transform_7(%arg0: i32) -> (i32, i32) {
    %c0_i32 = arith.constant 0 : i32
    %c0_i32_0 = arith.constant 0 : i32
    %c0_i32_1 = arith.constant 0 : i32
    return %c0_i32, %c0_i32_0 : i32, i32
  }
  func.func @transform_8(%arg0: i32) -> (i32, i32) {
    %c0_i32 = arith.constant 0 : i32
    %c0_i32_0 = arith.constant 0 : i32
    %c0_i32_1 = arith.constant 0 : i32
    return %c0_i32, %c0_i32_0 : i32, i32
  }
  func.func @transform_9(%arg0: i32) -> (i32, i32) {
    %c0_i32 = arith.constant 0 : i32
    %c0_i32_0 = arith.constant 0 : i32
    %c0_i32_1 = arith.constant 0 : i32
    return %c0_i32, %c0_i32_0 : i32, i32
  }
  func.func @transform_10(%arg0: i32) -> (i32, i32) {
    %c0_i32 = arith.constant 0 : i32
    %c0_i32_0 = arith.constant 0 : i32
    %c0_i32_1 = arith.constant 0 : i32
    return %c0_i32, %c0_i32_0 : i32, i32
  }
  func.func @transform_11(%arg0: i32) -> (i32, i32) {
    %c0_i32 = arith.constant 0 : i32
    %c0_i32_0 = arith.constant 0 : i32
    %c0_i32_1 = arith.constant 0 : i32
    return %c0_i32, %c0_i32_0 : i32, i32
  }
  func.func @transform_12(%arg0: i32) -> (i32, i32) {
    %c0_i32 = arith.constant 0 : i32
    %c0_i32_0 = arith.constant 0 : i32
    %c0_i32_1 = arith.constant 0 : i32
    return %c0_i32, %c0_i32_0 : i32, i32
  }
  func.func @transform_13(%arg0: i32) -> (i32, i32) {
    %c0_i32 = arith.constant 0 : i32
    %c0_i32_0 = arith.constant 0 : i32
    %c0_i32_1 = arith.constant 0 : i32
    return %c0_i32, %c0_i32_0 : i32, i32
  }
  func.func @transform_14(%arg0: i32) -> (i32, i32) {
    %c0_i32 = arith.constant 0 : i32
    %c0_i32_0 = arith.constant 0 : i32
    %c0_i32_1 = arith.constant 0 : i32
    return %c0_i32, %c0_i32_0 : i32, i32
  }
  func.func @transform_15(%arg0: i32) -> (i32, i32) {
    %c0_i32 = arith.constant 0 : i32
    %c0_i32_0 = arith.constant 0 : i32
    %c0_i32_1 = arith.constant 0 : i32
    return %c0_i32, %c0_i32_0 : i32, i32
  }
  func.func @transform_16(%arg0: i32) -> (i32, i32) {
    %c0_i32 = arith.constant 0 : i32
    %c0_i32_0 = arith.constant 0 : i32
    %c0_i32_1 = arith.constant 0 : i32
    return %c0_i32, %c0_i32_0 : i32, i32
  }
  func.func @transform_17(%arg0: i32) -> (i32, i32) {
    %c0_i32 = arith.constant 0 : i32
    %c0_i32_0 = arith.constant 0 : i32
    %c0_i32_1 = arith.constant 0 : i32
    return %c0_i32, %c0_i32_0 : i32, i32
  }
  func.func @transform_18(%arg0: i32) -> (i32, i32) {
    %c0_i32 = arith.constant 0 : i32
    %c0_i32_0 = arith.constant 0 : i32
    %c0_i32_1 = arith.constant 0 : i32
    return %c0_i32, %c0_i32_0 : i32, i32
  }
  func.func @transform_19(%arg0: i32) -> (i32, i32) {
    %c0_i32 = arith.constant 0 : i32
    %c0_i32_0 = arith.constant 0 : i32
    %c0_i32_1 = arith.constant 0 : i32
    return %c0_i32, %c0_i32_0 : i32, i32
  }
  func.func @transform_20(%arg0: i32) -> (i32, i32) {
    %c0_i32 = arith.constant 0 : i32
    %c0_i32_0 = arith.constant 0 : i32
    %c0_i32_1 = arith.constant 0 : i32
    return %c0_i32, %c0_i32_0 : i32, i32
  }
  func.func @transform_21(%arg0: i32) -> i32 {
    %c0_i32 = arith.constant 0 : i32
    %c0_i32_0 = arith.constant 0 : i32
    return %c0_i32 : i32
  }
  func.func @transform_22(%arg0: i32) -> (i32, i32) {
    %c0_i32 = arith.constant 0 : i32
    %c0_i32_0 = arith.constant 0 : i32
    return %arg0, %c0_i32 : i32, i32
  }
}

</mosaic_0001>

<bundles_post_ra>
// kernel: cnn_transformer_forward.1
= control target key start
LH: loop header
LB: loop body
LE: loop exit
PB: predicated region body
PF: predicated region fallthrough
CT: control target
= control target key end

     0   :  { %s3438_s0 = inlined_call_operand.hbm [shape: f32[2,4,16], index: 0, kind: input, shape index: {}]   ;;  %s3439_s1 = inlined_call_operand.hbm [shape: bf16[12,16], index: 1, kind: input, shape index: {}]   ;;  %s3440_s2 = inlined_call_operand.hbm [shape: f32[1,16], index: 2, kind: input, shape index: {}]   ;;  %s3441_s3 = inlined_call_operand.hbm [shape: bf16[48,16], index: 3, kind: input, shape index: {}]   ;;  %s3442_s4 = inlined_call_operand.hbm [shape: f32[1,16], index: 4, kind: input, shape index: {}]   ;;  %s3443_s5 = inlined_call_operand.hbm [shape: f32[2], index: 5, kind: input, shape index: {}]   ;;  %s3444_s6 = inlined_call_operand.hbm [shape: bf16[16,16], index: 6, kind: input, shape index: {}]   ;;  %s3445_s7 = inlined_call_operand.hbm [shape: f32[1,16], index: 7, kind: input, shape index: {}]   ;;  %s3446_s8 = inlined_call_operand.hbm [shape: bf16[16,32], index: 8, kind: input, shape index: {}]   ;;  %s3447_s9 = inlined_call_operand.hbm [shape: f32[1,32], index: 9, kind: input, shape index: {}]   ;;  %s3448_s10 = inlined_call_operand.hbm [shape: bf16[16,16], index: 10, kind: input, shape index: {}]   ;;  %s3449_s11 = inlined_call_operand.hbm [shape: f32[1,16], index: 11, kind: input, shape index: {}]   ;;  %s3450_s12 = inlined_call_operand.hbm [shape: f32[1,16], index: 12, kind: input, shape index: {}]   ;;  %s3451_s13 = inlined_call_operand.hbm [shape: f32[1,16], index: 13, kind: input, shape index: {}]   ;;  %s3452_s14 = inlined_call_operand.hbm [shape: bf16[16,32], index: 14, kind: input, shape index: {}]   ;;  %s3453_s15 = inlined_call_operand.hbm [shape: f32[1,32], index: 15, kind: input, shape index: {}]   ;;  %s3454_s16 = inlined_call_operand.hbm [shape: bf16[32,16], index: 16, kind: input, shape index: {}]   ;;  %s3455_s17 = inlined_call_operand.hbm [shape: f32[1,16], index: 17, kind: input, shape index: {}]   ;;  %s3456_s18 = inlined_call_operand.hbm [shape: f32[1,16], index: 18, kind: input, shape index: {}]   ;;  %s3457_s19 = inlined_call_operand.hbm [shape: f32[1,16], index: 19, kind: input, shape index: {}]   ;;  %s3458_s20 = inlined_call_operand.hbm [shape: f32[1,16], index: 20, kind: input, shape index: {}]   ;;  %s3459_s21 = inlined_call_operand.<no memory space> [shape: f32[1], index: 21, kind: input, shape index: {}]   ;;  %s3460_s22 = inlined_call_operand.hbm [shape: f32[2,1], index: 22, kind: output, shape index: {}]  }
   0x1   :  { %3470 = sst [smem:[#allocation51_spill]] %s3438_s0 }
   0x2   :  { %3471 = sst [smem:[#allocation52_spill]] %s3439_s1 }
   0x3   :  { %3472 = sst [smem:[#allocation53_spill]] %s3440_s2 }
   0x4   :  { %3473 = sst [smem:[#allocation54_spill]] %s3441_s3 }
   0x5   :  { %3474 = sst [smem:[#allocation55_spill]] %s3442_s4 }
   0x6   :  { %3475 = sst [smem:[#allocation56_spill]] %s3443_s5 }
   0x7   :  { %3476 = sst [smem:[#allocation57_spill]] %s3444_s6 }
   0x8   :  { %3477 = sst [smem:[#allocation58_spill]] %s3458_s20 }
   0x9   :  { %3478 = sst [smem:[#allocation59_spill]] %s3459_s21 }
   0xa   :  { %3479 = sst [smem:[#allocation60_spill]] %s3460_s22 }
   0xb   :  { %28 = vsyncpa [#allocation4], 0 }
   0xc   :  { %29 = vsyncpa [#allocation8], 0 }
   0xd   :  { %30 = vsyncpa [#allocation11], 0 }
   0xe   :  { %31 = vsyncpa [#allocation6], 0 }
   0xf   :  { %32 = vsyncpa [#allocation15], 0 }
  0x10   :  { %33 = vsyncpa [#allocation18], 0 }
  0x11   :  { %34 = vsyncpa [#allocation21], 0 }
  0x12   :  { %35 = vsyncpa [#allocation24], 0 }
  0x13   :  { %36 = vsyncpa [#allocation27], 0 }
  0x14   :  { %37 = vsyncpa [#allocation30], 0 }
  0x15   :  { %38 = vsyncpa [#allocation33], 0 }
  0x16   :  { %39 = vsyncpa [#allocation36], 0 }
  0x17   :  { %40 = vsyncpa [#allocation5], 0  ;;  %s2683_s3 = smov [#allocation7]   ;;  %s2684_s29 = smov [#allocation10]  }
  0x18   :  { %s58_s28 = sshll.u32 %s2683_s3, 4  ;;  %s80_s30 = sshll.u32 %s2684_s29, 4  ;;  %s59_s28 = int_to_ptr.vmem [resolvable:$true] %s58_s28  ;;  %s2832_s30 = int_to_ptr.vmem [resolvable:$true] %s80_s30 }
  0x19   :  { %s3480_s23 = sld [smem:[#allocation52_spill]] }
  0x1f   :  { %s2185_s1 = scalar_lea.hbm %s3480_s23, 128 }
  0x20   :  { %p2186_p0 = scmp.ne.s32.totalorder %s3480_s23, %s2185_s1  ;;  %p2189_p1 = scmp.lt.u32.totalorder %s2185_s1, %s3480_s23 }
  0x22   :  { %p2191_p2 = pnand %p2189_p1, %p2186_p0 }
  0x24   :  { %2194 = shalt.err (!%p2191_p2)
}
  0x25   :  { %s2195_s26 = scalar_lea.vmem %s59_s28, 128  ;;  %p2200_p4 = scmp.lt.s32.totalorder %s59_s28, %s59_s28 }
  0x26   :  { %p2196_p3 = scmp.ne.s32.totalorder %s59_s28, %s2195_s26  ;;  %p2201_p5 = scmp.lt.s32.totalorder %s2195_s26, %s2195_s26 }
  0x28   :  { %p2202_p6 = por %p2201_p5, %p2200_p4 }
  0x2a   :  { %p2203_p7 = pnand %p2202_p6, %p2196_p3 }
  0x2c   :  { %2206 = shalt.err (!%p2203_p7)
}
  0x2d   :  { %s2685_s2 = smov 64   ;;  %s2686_s27 = smov 4  }
  0x2e   :  { %64 = dma.hbm_to_vmem [thread:$0]  %s3480_s23, 128, %s59_s28, [#allocation8], %s2685_s2, %s2685_s2, %s2686_s27  }
  0x2f   :  { %s3481_s1 = sld [smem:[#allocation54_spill]] }
  0x35   :  { %s2207_s5 = scalar_lea.hbm %s3481_s1, 384 }
  0x36   :  { %p2208_p8 = scmp.ne.s32.totalorder %s3481_s1, %s2207_s5  ;;  %p2211_p9 = scmp.lt.u32.totalorder %s2207_s5, %s3481_s1 }
  0x38   :  { %p2213_p10 = pnand %p2211_p9, %p2208_p8 }
  0x3a   :  { %2216 = shalt.err (!%p2213_p10)
}
  0x3b   :  { %s2217_s22 = scalar_lea.vmem %s2832_s30, 384  ;;  %p2222_p12 = scmp.lt.s32.totalorder %s2832_s30, %s2832_s30 }
  0x3c   :  { %p2218_p11 = scmp.ne.s32.totalorder %s2832_s30, %s2217_s22  ;;  %p2223_p13 = scmp.lt.s32.totalorder %s2217_s22, %s2217_s22 }
  0x3e   :  { %p2224_p0 = por %p2223_p13, %p2222_p12 }
  0x40   :  { %p2225_p1 = pnand %p2224_p0, %p2218_p11 }
  0x42   :  { %2228 = shalt.err (!%p2225_p1)
}
  0x43   :  { %86 = dma.hbm_to_vmem [thread:$0]  %s3481_s1, 384, %s2832_s30, [#allocation11], %s2685_s2, %s2685_s2, %s2686_s27  }
  0x44   :  { %s2687_s3 = smov [#allocation14]   ;;  %s2688_s4 = smov [#allocation17]  }
  0x45   :  { %s110_s29 = sshll.u32 %s2687_s3, 4  ;;  %s132_s0 = sshll.u32 %s2688_s4, 4  ;;  %s111_s29 = int_to_ptr.vmem [resolvable:$true] %s110_s29  ;;  %s2869_s0 = int_to_ptr.vmem [resolvable:$true] %s132_s0 }
  0x46   :  { %s3482_s24 = sld [smem:[#allocation57_spill]] }
  0x4c   :  { %s2229_s6 = scalar_lea.hbm %s3482_s24, 128 }
  0x4d   :  { %p2230_p2 = scmp.ne.s32.totalorder %s3482_s24, %s2229_s6  ;;  %p2233_p3 = scmp.lt.u32.totalorder %s2229_s6, %s3482_s24 }
  0x4f   :  { %p2235_p4 = pnand %p2233_p3, %p2230_p2 }
  0x51   :  { %2238 = shalt.err (!%p2235_p4)
}
  0x52   :  { %s2239_s30 = scalar_lea.vmem %s111_s29, 128  ;;  %p2244_p6 = scmp.lt.s32.totalorder %s111_s29, %s111_s29 }
  0x53   :  { %p2240_p5 = scmp.ne.s32.totalorder %s111_s29, %s2239_s30  ;;  %p2245_p7 = scmp.lt.s32.totalorder %s2239_s30, %s2239_s30 }
  0x55   :  { %p2246_p8 = por %p2245_p7, %p2244_p6 }
  0x57   :  { %p2247_p9 = pnand %p2246_p8, %p2240_p5 }
  0x59   :  { %2250 = shalt.err (!%p2247_p9)
}
  0x5a   :  { %116 = dma.hbm_to_vmem [thread:$0]  %s3482_s24, 128, %s111_s29, [#allocation15], %s2685_s2, %s2685_s2, %s2686_s27  }
  0x5b   :  { %s2251_s20 = scalar_lea.hbm %s3446_s8, 128 }
  0x5c   :  { %p2252_p10 = scmp.ne.s32.totalorder %s3446_s8, %s2251_s20  ;;  %p2255_p11 = scmp.lt.u32.totalorder %s2251_s20, %s3446_s8 }
  0x5e   :  { %p2257_p12 = pnand %p2255_p11, %p2252_p10 }
  0x60   :  { %2260 = shalt.err (!%p2257_p12)
}
  0x61   :  { %s2261_s6 = scalar_lea.vmem %s2869_s0, 128  ;;  %p2266_p0 = scmp.lt.s32.totalorder %s2869_s0, %s2869_s0 }
  0x62   :  { %p2262_p13 = scmp.ne.s32.totalorder %s2869_s0, %s2261_s6  ;;  %p2267_p1 = scmp.lt.s32.totalorder %s2261_s6, %s2261_s6 }
  0x64   :  { %p2268_p2 = por %p2267_p1, %p2266_p0 }
  0x66   :  { %p2269_p3 = pnand %p2268_p2, %p2262_p13 }
  0x68   :  { %2272 = shalt.err (!%p2269_p3)
}
  0x69   :  { %138 = dma.hbm_to_vmem [thread:$0]  %s3446_s8, 128, %s2869_s0, [#allocation18], %s2685_s2, %s2685_s2, %s2686_s27  }
  0x6a   :  { %s2689_s25 = smov [#allocation20]   ;;  %s2690_s30 = smov [#allocation23]  }
  0x6b   :  { %s154_s26 = sshll.u32 %s2689_s25, 4  ;;  %s177_s1 = sshll.u32 %s2690_s30, 4  ;;  %s155_s26 = int_to_ptr.vmem [resolvable:$true] %s154_s26  ;;  %s178_s1 = int_to_ptr.vmem [resolvable:$true] %s177_s1 }
  0x6c   :  { %s2273_s3 = scalar_lea.hbm %s3448_s10, 128 }
  0x6d   :  { %p2274_p4 = scmp.ne.s32.totalorder %s3448_s10, %s2273_s3  ;;  %p2277_p5 = scmp.lt.u32.totalorder %s2273_s3, %s3448_s10 }
  0x6f   :  { %p2279_p6 = pnand %p2277_p5, %p2274_p4 }
  0x71   :  { %2282 = shalt.err (!%p2279_p6)
}
  0x72   :  { %s2283_s8 = scalar_lea.vmem %s155_s26, 128  ;;  %p2288_p8 = scmp.lt.s32.totalorder %s155_s26, %s155_s26 }
  0x73   :  { %p2284_p7 = scmp.ne.s32.totalorder %s155_s26, %s2283_s8  ;;  %p2289_p9 = scmp.lt.s32.totalorder %s2283_s8, %s2283_s8 }
  0x75   :  { %p2290_p10 = por %p2289_p9, %p2288_p8 }
  0x77   :  { %p2291_p11 = pnand %p2290_p10, %p2284_p7 }
  0x79   :  { %2294 = shalt.err (!%p2291_p11)
}
  0x7a   :  { %160 = dma.hbm_to_vmem [thread:$0]  %s3448_s10, 128, %s155_s26, [#allocation21], %s2685_s2, %s2685_s2, %s2686_s27  }
  0x7b   :  { %s2295_s24 = scalar_lea.hbm %s3450_s12, 16 }
  0x7c   :  { %p2296_p12 = scmp.ne.s32.totalorder %s3450_s12, %s2295_s24  ;;  %p2299_p13 = scmp.lt.u32.totalorder %s2295_s24, %s3450_s12 }
  0x7e   :  { %p2301_p0 = pnand %p2299_p13, %p2296_p12 }
  0x80   :  { %2304 = shalt.err (!%p2301_p0)
}
  0x81   :  { %s2305_s3 = scalar_lea.vmem %s178_s1, 16  ;;  %s2309_s20 = scalar_lea.vmem %s178_s1, 32 }
  0x82   :  { %p2306_p1 = scmp.ne.s32.totalorder %s178_s1, %s2305_s3  ;;  %p2310_p2 = scmp.lt.s32.totalorder %s178_s1, %s178_s1 }
  0x83   :  { %p2311_p3 = scmp.lt.s32.totalorder %s2309_s20, %s2305_s3 }
  0x85   :  { %p2312_p4 = por %p2311_p3, %p2310_p2 }
  0x87   :  { %p2313_p5 = pnand %p2312_p4, %p2306_p1 }
  0x89   :  { %2316 = shalt.err (!%p2313_p5)
}
  0x8a   :  { %180 = dma.hbm_to_vmem [thread:$0]  %s3450_s12, 16, %s178_s1, [#allocation24]  }
  0x8b   :  { %s2691_s21 = smov [#allocation26]   ;;  %s2692_s5 = smov [#allocation29]  }
  0x8c   :  { %s196_s4 = sshll.u32 %s2691_s21, 4  ;;  %s218_s8 = sshll.u32 %s2692_s5, 4  ;;  %s197_s4 = int_to_ptr.vmem [resolvable:$true] %s196_s4  ;;  %s2933_s8 = int_to_ptr.vmem [resolvable:$true] %s218_s8 }
  0x8d   :  { %s2317_s6 = scalar_lea.hbm %s3452_s14, 128 }
  0x8e   :  { %p2318_p6 = scmp.ne.s32.totalorder %s3452_s14, %s2317_s6  ;;  %p2321_p7 = scmp.lt.u32.totalorder %s2317_s6, %s3452_s14 }
  0x90   :  { %p2323_p8 = pnand %p2321_p7, %p2318_p6 }
  0x92   :  { %2326 = shalt.err (!%p2323_p8)
}
  0x93   :  { %s2327_s12 = scalar_lea.vmem %s197_s4, 128  ;;  %p2332_p10 = scmp.lt.s32.totalorder %s197_s4, %s197_s4 }
  0x94   :  { %p2328_p9 = scmp.ne.s32.totalorder %s197_s4, %s2327_s12  ;;  %p2333_p11 = scmp.lt.s32.totalorder %s2327_s12, %s2327_s12 }
  0x96   :  { %p2334_p12 = por %p2333_p11, %p2332_p10 }
  0x98   :  { %p2335_p13 = pnand %p2334_p12, %p2328_p9 }
  0x9a   :  { %2338 = shalt.err (!%p2335_p13)
}
  0x9b   :  { %202 = dma.hbm_to_vmem [thread:$0]  %s3452_s14, 128, %s197_s4, [#allocation27], %s2685_s2, %s2685_s2, %s2686_s27  }
  0x9c   :  { %s2339_s20 = scalar_lea.hbm %s3454_s16, 256 }
  0x9d   :  { %p2340_p0 = scmp.ne.s32.totalorder %s3454_s16, %s2339_s20  ;;  %p2343_p1 = scmp.lt.u32.totalorder %s2339_s20, %s3454_s16 }
  0x9f   :  { %p2345_p2 = pnand %p2343_p1, %p2340_p0 }
  0xa1   :  { %2348 = shalt.err (!%p2345_p2)
}
  0xa2   :  { %s2349_s0 = scalar_lea.vmem %s2933_s8, 256  ;;  %p2354_p4 = scmp.lt.s32.totalorder %s2933_s8, %s2933_s8 }
  0xa3   :  { %p2350_p3 = scmp.ne.s32.totalorder %s2933_s8, %s2349_s0  ;;  %p2355_p5 = scmp.lt.s32.totalorder %s2349_s0, %s2349_s0 }
  0xa5   :  { %p2356_p6 = por %p2355_p5, %p2354_p4 }
  0xa7   :  { %p2357_p7 = pnand %p2356_p6, %p2350_p3 }
  0xa9   :  { %2360 = shalt.err (!%p2357_p7)
}
  0xaa   :  { %224 = dma.hbm_to_vmem [thread:$0]  %s3454_s16, 256, %s2933_s8, [#allocation30], %s2685_s2, %s2685_s2, %s2686_s27  }
  0xab   :  { %s2693_s22 = smov [#allocation32]   ;;  %s2694_s29 = smov [#allocation3]  }
  0xac   :  { %s241_s6 = sshll.u32 %s2693_s22, 4  ;;  %s46_s24 = sshll.u32 %s2694_s29, 4  ;;  %s242_s6 = int_to_ptr.vmem [resolvable:$true] %s241_s6  ;;  %s2970_s24 = int_to_ptr.vmem [resolvable:$true] %s46_s24 }
  0xad   :  { %s2361_s12 = scalar_lea.hbm %s3456_s18, 16 }
  0xae   :  { %p2362_p8 = scmp.ne.s32.totalorder %s3456_s18, %s2361_s12  ;;  %p2365_p9 = scmp.lt.u32.totalorder %s2361_s12, %s3456_s18 }
  0xb0   :  { %p2367_p10 = pnand %p2365_p9, %p2362_p8 }
  0xb2   :  { %2370 = shalt.err (!%p2367_p10)
}
  0xb3   :  { %s2371_s16 = scalar_lea.vmem %s242_s6, 16  ;;  %s2375_s8 = scalar_lea.vmem %s242_s6, 32 }
  0xb4   :  { %p2372_p11 = scmp.ne.s32.totalorder %s242_s6, %s2371_s16  ;;  %p2376_p12 = scmp.lt.s32.totalorder %s242_s6, %s242_s6 }
  0xb5   :  { %p2377_p13 = scmp.lt.s32.totalorder %s2375_s8, %s2371_s16 }
  0xb7   :  { %p2378_p0 = por %p2377_p13, %p2376_p12 }
  0xb9   :  { %p2379_p1 = pnand %p2378_p0, %p2372_p11 }
  0xbb   :  { %2382 = shalt.err (!%p2379_p1)
}
  0xbc   :  { %244 = dma.hbm_to_vmem [thread:$0]  %s3456_s18, 16, %s242_s6, [#allocation33]  }
  0xbd   :  { %s3483_s5 = sld [smem:[#allocation51_spill]] }
  0xc3   :  { %s2383_s0 = scalar_lea.hbm %s3483_s5, 128 }
  0xc4   :  { %p2384_p2 = scmp.ne.s32.totalorder %s3483_s5, %s2383_s0  ;;  %p2387_p3 = scmp.lt.u32.totalorder %s2383_s0, %s3483_s5 }
  0xc6   :  { %p2389_p4 = pnand %p2387_p3, %p2384_p2 }
  0xc8   :  { %2392 = shalt.err (!%p2389_p4)
}
  0xc9   :  { %s2393_s25 = scalar_lea.vmem %s2970_s24, 128  ;;  %p2398_p6 = scmp.lt.s32.totalorder %s2970_s24, %s2970_s24 }
  0xca   :  { %p2394_p5 = scmp.ne.s32.totalorder %s2970_s24, %s2393_s25  ;;  %p2399_p7 = scmp.lt.s32.totalorder %s2393_s25, %s2393_s25 }
  0xcc   :  { %p2400_p8 = por %p2399_p7, %p2398_p6 }
  0xce   :  { %p2401_p9 = pnand %p2400_p8, %p2394_p5 }
  0xd0   :  { %2404 = shalt.err (!%p2401_p9)
}
  0xd1   :  { %52 = dma.hbm_to_vmem [thread:$0]  %s3483_s5, 128, %s2970_s24, [#allocation4], %s2685_s2, %s2685_s2, %s2686_s27  }
  0xd2   :  { %s2695_s30 = smov [#allocation9]   ;;  %s2696_s1 = smov [#allocation12]  }
  0xd3   :  { %s71_s12 = sshll.u32 %s2695_s30, 4  ;;  %s93_s28 = sshll.u32 %s2696_s1, 4  ;;  %s72_s12 = int_to_ptr.vmem [resolvable:$true] %s71_s12  ;;  %s94_s28 = int_to_ptr.vmem [resolvable:$true] %s93_s28 }
  0xd4   :  { %s3484_s16 = sld [smem:[#allocation53_spill]] }
  0xda   :  { %s2405_s8 = scalar_lea.hbm %s3484_s16, 16 }
  0xdb   :  { %p2406_p10 = scmp.ne.s32.totalorder %s3484_s16, %s2405_s8  ;;  %p2409_p11 = scmp.lt.u32.totalorder %s2405_s8, %s3484_s16 }
  0xdd   :  { %p2411_p12 = pnand %p2409_p11, %p2406_p10 }
  0xdf   :  { %2414 = shalt.err (!%p2411_p12)
}
  0xe0   :  { %s2415_s2 = scalar_lea.vmem %s72_s12, 16  ;;  %s2419_s24 = scalar_lea.vmem %s72_s12, 32 }
  0xe1   :  { %p2416_p13 = scmp.ne.s32.totalorder %s72_s12, %s2415_s2  ;;  %p2420_p0 = scmp.lt.s32.totalorder %s72_s12, %s72_s12 }
  0xe2   :  { %p2421_p1 = scmp.lt.s32.totalorder %s2419_s24, %s2415_s2 }
  0xe4   :  { %p2422_p2 = por %p2421_p1, %p2420_p0 }
  0xe6   :  { %p2423_p3 = pnand %p2422_p2, %p2416_p13 }
  0xe8   :  { %2426 = shalt.err (!%p2423_p3)
}
  0xe9   :  { %74 = dma.hbm_to_vmem [thread:$0]  %s3484_s16, 16, %s72_s12, [#allocation8]  }
  0xea   :  { %s3485_s22 = sld [smem:[#allocation55_spill]] }
  0xf0   :  { %s2427_s29 = scalar_lea.hbm %s3485_s22, 16 }
  0xf1   :  { %p2428_p4 = scmp.ne.s32.totalorder %s3485_s22, %s2427_s29  ;;  %p2431_p5 = scmp.lt.u32.totalorder %s2427_s29, %s3485_s22 }
  0xf3   :  { %p2433_p6 = pnand %p2431_p5, %p2428_p4 }
  0xf5   :  { %2436 = shalt.err (!%p2433_p6)
}
  0xf6   :  { %s2437_s1 = scalar_lea.vmem %s94_s28, 16  ;;  %s2441_s23 = scalar_lea.vmem %s94_s28, 32 }
  0xf7   :  { %p2438_p7 = scmp.ne.s32.totalorder %s94_s28, %s2437_s1  ;;  %p2442_p8 = scmp.lt.s32.totalorder %s94_s28, %s94_s28 }
  0xf8   :  { %p2443_p9 = scmp.lt.s32.totalorder %s2441_s23, %s2437_s1 }
  0xfa   :  { %p2444_p10 = por %p2443_p9, %p2442_p8 }
  0xfc   :  { %p2445_p11 = pnand %p2444_p10, %p2438_p7 }
  0xfe   :  { %2448 = shalt.err (!%p2445_p11)
}
  0xff   :  { %96 = dma.hbm_to_vmem [thread:$0]  %s3485_s22, 16, %s94_s28, [#allocation11]  }
 0x100   :  { %s3486_s20 = sld [smem:[#allocation56_spill]] }
 0x106   :  { %s2449_s10 = scalar_lea.hbm %s3486_s20, 16 }
 0x107   :  { %p2450_p12 = scmp.ne.s32.totalorder %s3486_s20, %s2449_s10  ;;  %p2453_p13 = scmp.lt.u32.totalorder %s2449_s10, %s3486_s20 }
 0x109   :  { %p2455_p0 = pnand %p2453_p13, %p2450_p12 }
 0x10b   :  { %2458 = shalt.err (!%p2455_p0)
}
 0x10c   :  { %s2697_s5 = smov [#allocation13]   ;;  %s2698_s28 = smov [#allocation16]  }
 0x10d   :  { %104 = dma.hbm_to_smem %s3486_s20, 16, %s2697_s5, [#allocation6]  }
 0x10e   :  { %s123_s4 = sshll.u32 %s2698_s28, 4  ;;  %s2699_s22 = smov [#allocation19]   ;;  %s124_s4 = int_to_ptr.vmem [resolvable:$true] %s123_s4 }
 0x10f   :  { %s145_s29 = sshll.u32 %s2699_s22, 4  ;;  %s2459_s6 = scalar_lea.hbm %s3445_s7, 16  ;;  %s146_s29 = int_to_ptr.vmem [resolvable:$true] %s145_s29 }
 0x110   :  { %p2460_p1 = scmp.ne.s32.totalorder %s3445_s7, %s2459_s6  ;;  %p2463_p2 = scmp.lt.u32.totalorder %s2459_s6, %s3445_s7 }
 0x112   :  { %p2465_p3 = pnand %p2463_p2, %p2460_p1 }
 0x114   :  { %2468 = shalt.err (!%p2465_p3)
}
 0x115   :  { %s2469_s3 = scalar_lea.vmem %s124_s4, 16  ;;  %s2473_s16 = scalar_lea.vmem %s124_s4, 32 }
 0x116   :  { %p2470_p4 = scmp.ne.s32.totalorder %s124_s4, %s2469_s3  ;;  %p2474_p5 = scmp.lt.s32.totalorder %s124_s4, %s124_s4 }
 0x117   :  { %p2475_p6 = scmp.lt.s32.totalorder %s2473_s16, %s2469_s3 }
 0x119   :  { %p2476_p7 = por %p2475_p6, %p2474_p5 }
 0x11b   :  { %p2477_p8 = pnand %p2476_p7, %p2470_p4 }
 0x11d   :  { %2480 = shalt.err (!%p2477_p8)
}
 0x11e   :  { %126 = dma.hbm_to_vmem [thread:$0]  %s3445_s7, 16, %s124_s4, [#allocation15]  }
 0x11f   :  { %s2481_s21 = scalar_lea.hbm %s3447_s9, 16 }
 0x120   :  { %p2482_p9 = scmp.ne.s32.totalorder %s3447_s9, %s2481_s21  ;;  %p2485_p10 = scmp.lt.u32.totalorder %s2481_s21, %s3447_s9 }
 0x122   :  { %p2487_p11 = pnand %p2485_p10, %p2482_p9 }
 0x124   :  { %2490 = shalt.err (!%p2487_p11)
}
 0x125   :  { %s2491_s14 = scalar_lea.vmem %s146_s29, 16  ;;  %s2495_s28 = scalar_lea.vmem %s146_s29, 32 }
 0x126   :  { %p2492_p12 = scmp.ne.s32.totalorder %s146_s29, %s2491_s14  ;;  %p2496_p13 = scmp.lt.s32.totalorder %s146_s29, %s146_s29 }
 0x127   :  { %p2497_p0 = scmp.lt.s32.totalorder %s2495_s28, %s2491_s14 }
 0x129   :  { %p2498_p1 = por %p2497_p0, %p2496_p13 }
 0x12b   :  { %p2499_p2 = pnand %p2498_p1, %p2492_p12 }
 0x12d   :  { %2502 = shalt.err (!%p2499_p2)
}
 0x12e   :  { %148 = dma.hbm_to_vmem [thread:$0]  %s3447_s9, 16, %s146_s29, [#allocation18]  }
 0x12f   :  { %s2700_s22 = smov [#allocation22]   ;;  %s2701_s18 = smov [#allocation25]  }
 0x130   :  { %s167_s25 = sshll.u32 %s2700_s22, 4  ;;  %s187_s6 = sshll.u32 %s2701_s18, 4  ;;  %s168_s25 = int_to_ptr.vmem [resolvable:$true] %s167_s25  ;;  %s188_s6 = int_to_ptr.vmem [resolvable:$true] %s187_s6 }
 0x131   :  { %s2503_s23 = scalar_lea.hbm %s3449_s11, 16 }
 0x132   :  { %p2504_p3 = scmp.ne.s32.totalorder %s3449_s11, %s2503_s23  ;;  %p2507_p4 = scmp.lt.u32.totalorder %s2503_s23, %s3449_s11 }
 0x134   :  { %p2509_p5 = pnand %p2507_p4, %p2504_p3 }
 0x136   :  { %2512 = shalt.err (!%p2509_p5)
}
 0x137   :  { %s2513_s9 = scalar_lea.vmem %s168_s25, 16  ;;  %s2517_s29 = scalar_lea.vmem %s168_s25, 32 }
 0x138   :  { %p2514_p6 = scmp.ne.s32.totalorder %s168_s25, %s2513_s9  ;;  %p2518_p7 = scmp.lt.s32.totalorder %s168_s25, %s168_s25 }
 0x139   :  { %p2519_p8 = scmp.lt.s32.totalorder %s2517_s29, %s2513_s9 }
 0x13b   :  { %p2520_p9 = por %p2519_p8, %p2518_p7 }
 0x13d   :  { %p2521_p10 = pnand %p2520_p9, %p2514_p6 }
 0x13f   :  { %2524 = shalt.err (!%p2521_p10)
}
 0x140   :  { %170 = dma.hbm_to_vmem [thread:$0]  %s3449_s11, 16, %s168_s25, [#allocation21]  }
 0x141   :  { %s2525_s2 = scalar_lea.hbm %s3451_s13, 16 }
 0x142   :  { %p2526_p11 = scmp.ne.s32.totalorder %s3451_s13, %s2525_s2  ;;  %p2529_p12 = scmp.lt.u32.totalorder %s2525_s2, %s3451_s13 }
 0x144   :  { %p2531_p13 = pnand %p2529_p12, %p2526_p11 }
 0x146   :  { %2534 = shalt.err (!%p2531_p13)
}
 0x147   :  { %s2535_s28 = scalar_lea.vmem %s188_s6, 16  ;;  %s2539_s7 = scalar_lea.vmem %s188_s6, 32 }
 0x148   :  { %p2536_p0 = scmp.ne.s32.totalorder %s188_s6, %s2535_s28  ;;  %p2540_p1 = scmp.lt.s32.totalorder %s188_s6, %s188_s6 }
 0x149   :  { %p2541_p2 = scmp.lt.s32.totalorder %s2539_s7, %s2535_s28 }
 0x14b   :  { %p2542_p3 = por %p2541_p2, %p2540_p1 }
 0x14d   :  { %p2543_p4 = pnand %p2542_p3, %p2536_p0 }
 0x14f   :  { %2546 = shalt.err (!%p2543_p4)
}
 0x150   :  { %190 = dma.hbm_to_vmem [thread:$0]  %s3451_s13, 16, %s188_s6, [#allocation24]  }
 0x151   :  { %s2702_s22 = smov [#allocation28]   ;;  %s2703_s18 = smov [#allocation31]  }
 0x152   :  { %s209_s25 = sshll.u32 %s2702_s22, 4  ;;  %s231_s30 = sshll.u32 %s2703_s18, 4  ;;  %s210_s25 = int_to_ptr.vmem [resolvable:$true] %s209_s25  ;;  %s232_s30 = int_to_ptr.vmem [resolvable:$true] %s231_s30 }
 0x153   :  { %s2547_s12 = scalar_lea.hbm %s3453_s15, 16 }
 0x154   :  { %p2548_p5 = scmp.ne.s32.totalorder %s3453_s15, %s2547_s12  ;;  %p2551_p6 = scmp.lt.u32.totalorder %s2547_s12, %s3453_s15 }
 0x156   :  { %p2553_p7 = pnand %p2551_p6, %p2548_p5 }
 0x158   :  { %2556 = shalt.err (!%p2553_p7)
}
 0x159   :  { %s2557_s13 = scalar_lea.vmem %s210_s25, 16  ;;  %s2561_s6 = scalar_lea.vmem %s210_s25, 32 }
 0x15a   :  { %p2558_p8 = scmp.ne.s32.totalorder %s210_s25, %s2557_s13  ;;  %p2562_p9 = scmp.lt.s32.totalorder %s210_s25, %s210_s25 }
 0x15b   :  { %p2563_p10 = scmp.lt.s32.totalorder %s2561_s6, %s2557_s13 }
 0x15d   :  { %p2564_p11 = por %p2563_p10, %p2562_p9 }
 0x15f   :  { %p2565_p12 = pnand %p2564_p11, %p2558_p8 }
 0x161   :  { %2568 = shalt.err (!%p2565_p12)
}
 0x162   :  { %212 = dma.hbm_to_vmem [thread:$0]  %s3453_s15, 16, %s210_s25, [#allocation27]  }
 0x163   :  { %s2569_s21 = scalar_lea.hbm %s3455_s17, 16 }
 0x164   :  { %p2570_p13 = scmp.ne.s32.totalorder %s3455_s17, %s2569_s21  ;;  %p2573_p0 = scmp.lt.u32.totalorder %s2569_s21, %s3455_s17 }
 0x166   :  { %p2575_p1 = pnand %p2573_p0, %p2570_p13 }
 0x168   :  { %2578 = shalt.err (!%p2575_p1)
}
 0x169   :  { %s2579_s14 = scalar_lea.vmem %s232_s30, 16  ;;  %s2583_s28 = scalar_lea.vmem %s232_s30, 32 }
 0x16a   :  { %p2580_p2 = scmp.ne.s32.totalorder %s232_s30, %s2579_s14  ;;  %p2584_p3 = scmp.lt.s32.totalorder %s232_s30, %s232_s30 }
 0x16b   :  { %p2585_p4 = scmp.lt.s32.totalorder %s2583_s28, %s2579_s14 }
 0x16d   :  { %p2586_p5 = por %p2585_p4, %p2584_p3 }
 0x16f   :  { %p2587_p6 = pnand %p2586_p5, %p2580_p2 }
 0x171   :  { %2590 = shalt.err (!%p2587_p6)
}
 0x172   :  { %234 = dma.hbm_to_vmem [thread:$0]  %s3455_s17, 16, %s232_s30, [#allocation30]  }
 0x173   :  { %s2704_s11 = smov [#allocation34]   ;;  %s2705_s22 = smov [#allocation35]  }
 0x174   :  { %s251_s4 = sshll.u32 %s2704_s11, 4  ;;  %s261_s25 = sshll.u32 %s2705_s22, 4  ;;  %s252_s4 = int_to_ptr.vmem [resolvable:$true] %s251_s4  ;;  %s262_s25 = int_to_ptr.vmem [resolvable:$true] %s261_s25 }
 0x175   :  { %s2591_s23 = scalar_lea.hbm %s3457_s19, 16 }
 0x176   :  { %p2592_p7 = scmp.ne.s32.totalorder %s3457_s19, %s2591_s23  ;;  %p2595_p8 = scmp.lt.u32.totalorder %s2591_s23, %s3457_s19 }
 0x178   :  { %p2597_p9 = pnand %p2595_p8, %p2592_p7 }
 0x17a   :  { %2600 = shalt.err (!%p2597_p9)
}
 0x17b   :  { %s2601_s17 = scalar_lea.vmem %s252_s4, 16  ;;  %s2605_s30 = scalar_lea.vmem %s252_s4, 32 }
 0x17c   :  { %p2602_p10 = scmp.ne.s32.totalorder %s252_s4, %s2601_s17  ;;  %p2606_p11 = scmp.lt.s32.totalorder %s252_s4, %s252_s4 }
 0x17d   :  { %p2607_p12 = scmp.lt.s32.totalorder %s2605_s30, %s2601_s17 }
 0x17f   :  { %p2608_p13 = por %p2607_p12, %p2606_p11 }
 0x181   :  { %p2609_p0 = pnand %p2608_p13, %p2602_p10 }
 0x183   :  { %2612 = shalt.err (!%p2609_p0)
}
 0x184   :  { %254 = dma.hbm_to_vmem [thread:$0]  %s3457_s19, 16, %s252_s4, [#allocation33]  }
 0x185   :  { %s3487_s20 = sld [smem:[#allocation58_spill]] }
 0x18b   :  { %s2613_s10 = scalar_lea.hbm %s3487_s20, 16 }
 0x18c   :  { %p2614_p1 = scmp.ne.s32.totalorder %s3487_s20, %s2613_s10  ;;  %p2617_p2 = scmp.lt.u32.totalorder %s2613_s10, %s3487_s20 }
 0x18e   :  { %p2619_p3 = pnand %p2617_p2, %p2614_p1 }
 0x190   :  { %2622 = shalt.err (!%p2619_p3)
}
 0x191   :  { %s2623_s5 = scalar_lea.vmem %s262_s25, 16  ;;  %s2627_s0 = scalar_lea.vmem %s262_s25, 32 }
 0x192   :  { %p2624_p4 = scmp.ne.s32.totalorder %s262_s25, %s2623_s5  ;;  %p2628_p5 = scmp.lt.s32.totalorder %s262_s25, %s262_s25 }
 0x193   :  { %p2629_p6 = scmp.lt.s32.totalorder %s2627_s0, %s2623_s5 }
 0x195   :  { %p2630_p7 = por %p2629_p6, %p2628_p5 }
 0x197   :  { %p2631_p8 = pnand %p2630_p7, %p2624_p4 }
 0x199   :  { %2634 = shalt.err (!%p2631_p8)
}
 0x19a   :  { %264 = dma.hbm_to_vmem [thread:$0]  %s3487_s20, 16, %s262_s25, [#allocation36]  }
 0x19b   :  { %2657 = dma.done.wait [#allocation4], 128  }
 0x19c   :  { %2658 = vsyncadd [#allocation4], 4294967168 }
 0x19d   :  { %2659 = dma.done.wait [#allocation8], 144  }
 0x19e   :  { %2660 = vsyncadd [#allocation8], 4294967152 }
 0x19f   :  { %2661 = dma.done.wait [#allocation11], 400  }
 0x1a0   :  { %2662 = vsyncadd [#allocation11], 4294966896 }
 0x1a1   :  { %2663 = dma.done.wait [#allocation6], 16  }
 0x1a2   :  { %2664 = vsyncadd [#allocation6], 4294967280 }
 0x1a3   :  { %2665 = dma.done.wait [#allocation15], 144  }
 0x1a4   :  { %2666 = vsyncadd [#allocation15], 4294967152 }
 0x1a5   :  { %2667 = dma.done.wait [#allocation18], 144  }
 0x1a6   :  { %2668 = vsyncadd [#allocation18], 4294967152 }
 0x1a7   :  { %2669 = dma.done.wait [#allocation21], 144  }
 0x1a8   :  { %2670 = vsyncadd [#allocation21], 4294967152 }
 0x1a9   :  { %2671 = dma.done.wait [#allocation24], 32  }
 0x1aa   :  { %2672 = vsyncadd [#allocation24], 4294967264 }
 0x1ab   :  { %2673 = dma.done.wait [#allocation27], 144  }
 0x1ac   :  { %2674 = vsyncadd [#allocation27], 4294967152 }
 0x1ad   :  { %2675 = dma.done.wait [#allocation30], 272  }
 0x1ae   :  { %2676 = vsyncadd [#allocation30], 4294967024 }
 0x1af   :  { %2677 = dma.done.wait [#allocation33], 32  }
 0x1b0   :  { %2678 = vsyncadd [#allocation33], 4294967264 }
 0x1b1   :  { %2679 = dma.done.wait [#allocation36], 16  }
 0x1b2   :  { %2680 = vsyncadd [#allocation36], 4294967280 }
 0x1b3   :  { %330 = sfence }
 0x1b4   :  { %v332_v0 = vld [vmem:[#allocation3] sm:$0xf]  ;;  %vm334_vm0 = vcmask 125952   ;;  %v333_v1 = vld [vmem:[#allocation3 + $0x4] sm:$0xf]  ;;  %v430_v28 = vlaneseq  ;;  %vm548_vm2 = vcmask 1045504  }
 0x1b5   :  { %v335_v2 = vsel %vm334_vm0, %v332_v0, 0.0  ;;  %v344_v3 = vmul.f32 %v332_v0, %v332_v0  ;;  %v338_v4 = vsel %vm334_vm0, %v333_v1, 0.0  ;;  %v345_v5 = vmul.f32 %v333_v1, %v333_v1  ;;  %v2143_v34 = vld [vmem:[#allocation7] sm:$0x3f]   ;;  %s2706_s28 = smov 8   ;;  %s2707_s15 = smov 16  }
 0x1b6   :  { %336 = vadd.xlane.f32.xlu0 %v335_v2  ;;  %v3136_v29 = vshrl.u32 %v430_v28, 7  ;;  %2078 = vmatprep.subr.msk.bf16.mxu0 %vm548_vm2, %v2143_v34  ;;  %v550_v38 = vsel %vm548_vm2, %v2143_v34, 0  ;;  %vm515_vm4 = vcmask 31744   ;;  %vm520_vm7 = vcmask 64512   ;;  %s2708_s7 = smov 32   ;;  %s2709_s11 = smov 12  }
 0x1b7   :  { %v346_v6 = vsel %vm334_vm0, %v344_v3, 0.0  ;;  %v349_v7 = vsel %vm334_vm0, %v345_v5, 0.0  ;;  %1983 = vmatpush3.bf16.msra.mxu0 %v550_v38  ;;  %vm541_vm8 = vcmask 97280   ;;  %vm615_vm11 = vcmask 130048   ;;  %s1915_s4 = sld [smem:[#allocation13 + $0x1]]  ;;  %s2713_s22 = smov 112  }
 0x1b8   :  { %347 = vadd.xlane.f32.xlu1 %v346_v6  ;;  %v432_v30 = vadd.s32 8, %v3136_v29  ;;  %vm462_vm1 = vcmp.lt.s32.totalorder %v3136_v29, 7  ;;  %v3184_v54 = vadd.s32 4294967295, %v3136_v29  ;;  %vm437_vm5 = vcmp.lt.s32.totalorder %v3136_v29, 1  ;;  %s2714_s25 = smov 120   ;;  %s2715_s18 = smov 104  }
 0x1b9   :  { %vm736_vm14 = vcmask 261120   ;;  %vm774_vm15 = vcmask 392192   ;;  %vm2711_vm0 = vmmov 0   ;;  %s3488_s12 = sld [smem:[#allocation59_spill]]  ;;  %s2716_s3 = smov [#allocation37]  }
 0x1ba   :  { %339 = vadd.xlane.f32.xlu0 %v338_v4  ;;  %v3143_v32 = vadd.s32 1, %v432_v30  ;;  %vm444_vm6 = vcmp.ge.s32.totalorder %v3184_v54, 0  ;;  %s1885_s16 = sshll.u32 %s2716_s3, 4  ;;  %s1886_s16 = int_to_ptr.vmem [resolvable:$true] %s1885_s16 }
 0x1bb   :  { %s2635_s8 = scalar_lea.vmem %s1886_s16, 32  ;;  %p2640_p10 = scmp.lt.s32.totalorder %s1886_s16, %s1886_s16 }
 0x1bc   :  { %350 = vadd.xlane.f32.xlu1 %v349_v7  ;;  %vm472_vm3 = vcmp.lt.s32.totalorder %v3143_v32, 16  ;;  %p2636_p9 = scmp.ne.s32.totalorder %s1886_s16, %s2635_s8  ;;  %p2641_p11 = scmp.lt.s32.totalorder %s2635_s8, %s2635_s8 }
 0x1be   :  { %p2642_p12 = por %p2641_p11, %p2640_p10 }
 0x1c0   :  { %p2643_p13 = pnand %p2642_p12, %p2636_p9 }
 0x243   :  { %v337_v8 = vpop.xlane.xlu0 %336 }
 0x244   :  { %v342_v9 = vmul.f32 0.0625, %v337_v8 }
 0x245   :  { %v348_v10 = vpop.xlane.xlu1 %347 }
 0x246   :  { %v354_v11 = vmul.f32 %v342_v9, %v342_v9  ;;  %v352_v12 = vmul.f32 0.0625, %v348_v10  ;;  %v358_v22 = vsub.f32 %v332_v0, %v342_v9 }
 0x247   :  { %v340_v13 = vpop.xlane.xlu0 %339 }
 0x248   :  { %v356_v14 = vsub.f32 %v352_v12, %v354_v11  ;;  %v343_v15 = vmul.f32 0.0625, %v340_v13 }
 0x249   :  { %v351_v16 = vpop.xlane.xlu1 %350 }
 0x24a   :  { %v360_v17 = vadd.f32 1e-05, %v356_v14  ;;  %v355_v18 = vmul.f32 %v343_v15, %v343_v15  ;;  %v353_v19 = vmul.f32 0.0625, %v351_v16  ;;  %v359_v25 = vsub.f32 %v333_v1, %v343_v15 }
 0x24c   :  { %2153 = vrsqrt.f32 %v360_v17  ;;  %v357_v20 = vsub.f32 %v353_v19, %v355_v18 }
 0x24e   :  { %v361_v21 = vadd.f32 1e-05, %v357_v20 }
 0x250   :  { %2155 = vrsqrt.f32 %v361_v21  ;;  %v2144_v21 = vld [vmem:[#allocation10] sm:$0xff]  }
 0x251   :  { %1988 = vmatprep.subr.bf16.mxu1 %v2144_v21 }
 0x252   :  { %1989 = vmatpush3.bf16.msra.mxu1 %v2144_v21 }
 0x256   :  { %v2154_v23 = vpop.eup %2153 }
 0x257   :  { %v364_v24 = vmul.f32 %v2154_v23, %v358_v22  ;;  %v1905_v22 = vld [vmem:[#allocation9] ss:$0 sm:$0xff] }
 0x259   :  { %366 = vxpose.xlu0.b32.start.end [1/1] (short) (narrow) %v364_v24, 16 }
 0x25a   :  { %v2156_v26 = vpop.eup %2155 }
 0x25b   :  { %v365_v27 = vmul.f32 %v2156_v26, %v359_v25 }
 0x25d   :  { %398 = vxpose.xlu1.b32.start.end [1/1] (short) (narrow) %v365_v27, 16 }
 0x2d9   :  { %v3139_v31 = vpop.trf.xlu0 }
 0x2da   :  { %487 = vrot.lane.b32.xlu0 %v3139_v31, %s2686_s27  ;;  %v458_v33 = vrot.slane %v3139_v31, 1  ;;  %v433_v52 = vrot.slane %v3139_v31, 7 }
 0x2dd   :  { %v3146_v35 = vpop.trf.xlu1  ;;  %v3148_v36 = vpop.trf.xlu0 }
 0x2de   :  { %491 = vrot.lane.b32.xlu1 %v3146_v35, %s2686_s27  ;;  %v460_v37 = vrot.slane %v3148_v36, 1  ;;  %v459_v44 = vrot.slane %v3146_v35, 1  ;;  %v435_v53 = vrot.slane %v3148_v36, 7  ;;  %v434_v3 = vrot.slane %v3146_v35, 7 }
 0x2e0   :  { %v463_v39 = vsel %vm462_vm1, %v458_v33, %v460_v37  ;;  %v465_v40 = vsel %vm462_vm1, %v460_v37, %v458_v33  ;;  %v440_v57 = vsel %vm437_vm5, %v435_v53, %v433_v52  ;;  %v438_v63 = vsel %vm437_vm5, %v433_v52, %v435_v53 }
 0x2e1   :  { %v3159_v41 = vpop.trf.xlu1  ;;  %v480_v42 = vsel %vm472_vm3, %v465_v40, 0.0  ;;  %v454_v62 = vsel %vm444_vm6, %v440_v57, 0.0 }
 0x2e2   :  { %489 = vrot.lane.b32.xlu1 %v3148_v36, %s2686_s27  ;;  %v2113_v43 = vpack.i.bf16 %v480_v42, %v463_v39  ;;  %v461_v45 = vrot.slane %v3159_v41, 1  ;;  %v436_v60 = vrot.slane %v3159_v41, 7 }
 0x2e4   :  { %2114 = vrot.lane.b32.xlu0 %v2113_v43, %s2706_s28  ;;  %v466_v46 = vsel %vm462_vm1, %v461_v45, %v459_v44  ;;  %v464_v47 = vsel %vm462_vm1, %v459_v44, %v461_v45  ;;  %v441_v9 = vsel %vm437_vm5, %v436_v60, %v434_v3  ;;  %v439_v13 = vsel %vm437_vm5, %v434_v3, %v436_v60 }
 0x2e5   :  { %v482_v48 = vsel %vm472_vm3, %v466_v46, 0.0  ;;  %v456_v12 = vsel %vm444_vm6, %v441_v9, 0.0 }
 0x2e6   :  { %493 = vrot.lane.b32.xlu1 %v3159_v41, %s2686_s27  ;;  %v2118_v49 = vpack.i.bf16 %v482_v48, %v464_v47  ;;  %s605_s27 = sld [smem:[#allocation13]] }
 0x2ea   :  { %2119 = vrot.lane.b32.xlu1 %v2118_v49, %s2706_s28 }
 0x2ec   :  { %v606_v24 = vstv %s605_s27 }
 0x34c   :  { %v488_v50 = vpop.permute.xlu0 %487 }
 0x34d   :  { %v3179_v51 = vsel %vm515_vm4, %v3139_v31, %v488_v50  ;;  %v516_v2 = vsel %vm515_vm4, %v454_v62, %v488_v50 }
 0x350   :  { %v492_v55 = vpop.permute.xlu1 %491 }
 0x351   :  { %v3189_v56 = vsel %vm515_vm4, %v3146_v35, %v492_v55  ;;  %v518_v16 = vsel %vm515_vm4, %v456_v12, %v492_v55 }
 0x354   :  { %v490_v58 = vpop.permute.xlu1 %489 }
 0x355   :  { %v3196_v59 = vsel %vm515_vm4, %v3148_v36, %v490_v58  ;;  %v517_v4 = vsel %vm515_vm4, %v438_v63, %v490_v58 }
 0x356   :  { %v2115_v61 = vpop.permute.xlu0 %2114 }
 0x357   :  { %v2117_v0 = vunpack.i.h.bf16 %v2115_v61  ;;  %v2116_v1 = vunpack.i.l.bf16 %v2115_v61 }
 0x358   :  { %v494_v5 = vpop.permute.xlu1 %493 }
 0x359   :  { %v3208_v6 = vsel %vm515_vm4, %v3159_v41, %v494_v5  ;;  %v521_v7 = vsel %vm520_vm7, %v516_v2, %v2116_v1  ;;  %v522_v8 = vsel %vm520_vm7, %v517_v4, %v2117_v0  ;;  %v519_v17 = vsel %vm515_vm4, %v439_v13, %v494_v5 }
 0x35a   :  { %v525_v10 = vpack.c.bf16 %v522_v8, %v521_v7 }
 0x35c   :  { %v2120_v11 = vpop.permute.xlu1 %2119  ;;  %1984 = vmatprep.mubr.msk.bf16.mxu0 %vm541_vm8, %v525_v10 }
 0x35d   :  { %v2122_v14 = vunpack.i.h.bf16 %v2120_v11  ;;  %v2121_v15 = vunpack.i.l.bf16 %v2120_v11 }
 0x35f   :  { %v524_v18 = vsel %vm520_vm7, %v519_v17, %v2122_v14  ;;  %v523_v19 = vsel %vm520_vm7, %v518_v16, %v2121_v15 }
 0x360   :  { %v526_v20 = vpack.c.bf16 %v524_v18, %v523_v19 }
 0x362   :  { %1985 = vmatmul.mubr.msk.bf16.vlgmr.msra.gmra.mrb[0].mxu0 %vm541_vm8, %v526_v20 }
 0x435   :  { %v1986_v23 = vpop.f32.mrb[0].mxu0 }
 0x436   :  { %v595_v25 = vadd.f32 %v1986_v23, %v1905_v22  ;;  %v586_v26 = vpop.f32.mrb[1].mxu0 }
 0x437   :  { %v587_v27 = vadd.f32 %v1905_v22, %v586_v26  ;;  %v1987_v28 = vpop.f32.mrb[2].mxu0 }
 0x438   :  { %vm603_vm9 = vcmp.ge.f32.partialorder %v595_v25, 0.0  ;;  %v609_v30 = vmul.f32 %v606_v24, %v595_v25  ;;  %v598_v33 = vadd.f32 %v1987_v28, %v1905_v22  ;;  %v589_v34 = vpop.f32.mrb[3].mxu0 }
 0x439   :  { %vm601_vm10 = vcmp.ge.f32.partialorder %v587_v27, 0.0  ;;  %v607_v37 = vmul.f32 %v606_v24, %v587_v27  ;;  %v590_v38 = vadd.f32 %v1905_v22, %v589_v34 }
 0x43a   :  { %v3224_v39 = vsel %vm603_vm9, %v595_v25, %v609_v30  ;;  %vm604_vm12 = vcmp.ge.f32.partialorder %v598_v33, 0.0  ;;  %v610_v40 = vmul.f32 %v606_v24, %v598_v33  ;;  %vm1877_vm9 = vcmask 0  }
 0x43b   :  { %v638_v42 = vmul.f32 %v3224_v39, %v3224_v39  ;;  %v3228_v43 = vsel %vm601_vm10, %v587_v27, %v607_v37  ;;  %vm602_vm13 = vcmp.ge.f32.partialorder %v590_v38, 0.0  ;;  %v608_v45 = vmul.f32 %v606_v24, %v590_v38 }
 0x43c   :  { %v3230_v44 = vsel %vm604_vm12, %v598_v33, %v610_v40  ;;  %v625_v46 = vsel %vm615_vm11, %v3224_v39, 0.0  ;;  %v636_v47 = vmul.f32 %v3228_v43, %v3228_v43  ;;  %v616_v50 = vsel %vm615_vm11, %v3228_v43, 0.0 }
 0x43d   :  { %v626_v48 = vsel %vm615_vm11, %v3230_v44, 0.0  ;;  %v639_v49 = vmul.f32 %v3230_v44, %v3230_v44  ;;  %v3242_v53 = vsel %vm602_vm13, %v590_v38, %v608_v45  ;;  %v649_v55 = vsel %vm615_vm11, %v638_v42, 0.0 }
 0x43e   :  { %v627_v52 = vadd.f32 %v626_v48, %v625_v46  ;;  %v617_v58 = vsel %vm615_vm11, %v3242_v53, 0.0  ;;  %v637_v60 = vmul.f32 %v3242_v53, %v3242_v53  ;;  %v640_v0 = vsel %vm615_vm11, %v636_v47, 0.0 }
 0x43f   :  { %v650_v57 = vsel %vm615_vm11, %v639_v49, 0.0  ;;  %v618_v63 = vadd.f32 %v617_v58, %v616_v50  ;;  %v2145_v50 = vld [vmem:[#allocation10 + $0x8] sm:$0xff]  }
 0x440   :  { %v628_v61 = vrot.slane %v627_v52, 4  ;;  %v651_v62 = vadd.f32 %v650_v57, %v649_v55  ;;  %v641_v1 = vsel %vm615_vm11, %v637_v60, 0.0  ;;  %1990 = vmatprep.subr.bf16.mxu1 %v2145_v50 }
 0x441   :  { %v619_v4 = vrot.slane %v618_v63, 4  ;;  %v642_v5 = vadd.f32 %v641_v1, %v640_v0  ;;  %1991 = vmatpush3.bf16.msra.mxu1 %v2145_v50 }
 0x442   :  { %v629_v2 = vadd.f32 %v628_v61, %v627_v52  ;;  %v652_v3 = vrot.slane %v651_v62, 4 }
 0x443   :  { %v620_v9 = vadd.f32 %v619_v4, %v618_v63  ;;  %v643_v10 = vrot.slane %v642_v5, 4 }
 0x444   :  { %v630_v7 = vrot.slane %v629_v2, 2  ;;  %v653_v8 = vadd.f32 %v652_v3, %v651_v62 }
 0x445   :  { %v621_v13 = vrot.slane %v620_v9, 2  ;;  %v644_v14 = vadd.f32 %v643_v10, %v642_v5 }
 0x446   :  { %v631_v11 = vadd.f32 %v630_v7, %v629_v2  ;;  %v654_v12 = vrot.slane %v653_v8, 2 }
 0x447   :  { %v622_v17 = vadd.f32 %v621_v13, %v620_v9  ;;  %v645_v18 = vrot.slane %v644_v14, 2 }
 0x448   :  { %v632_v15 = vrot.slane %v631_v11, 1  ;;  %v655_v16 = vadd.f32 %v654_v12, %v653_v8 }
 0x449   :  { %v623_v21 = vrot.slane %v622_v17, 1  ;;  %v646_v22 = vadd.f32 %v645_v18, %v644_v14 }
 0x44a   :  { %v633_v19 = vadd.f32 %v632_v15, %v631_v11  ;;  %v656_v20 = vrot.slane %v655_v16, 1 }
 0x44b   :  { %v624_v25 = vadd.f32 %v623_v21, %v622_v17  ;;  %v647_v26 = vrot.slane %v646_v22, 1 }
 0x44c   :  { %v635_v23 = vmul.f32 0.0625, %v633_v19  ;;  %v657_v24 = vadd.f32 %v656_v20, %v655_v16 }
 0x44d   :  { %v634_v33 = vmul.f32 0.0625, %v624_v25  ;;  %v648_v34 = vadd.f32 %v647_v26, %v646_v22 }
 0x44e   :  { %v659_v27 = vmul.f32 0.0625, %v657_v24  ;;  %v661_v28 = vmul.f32 %v635_v23, %v635_v23  ;;  %v667_v30 = vsub.f32 %v3230_v44, %v635_v23  ;;  %v666_v37 = vsub.f32 %v3224_v39, %v635_v23  ;;  %v2146_v44 = vld [vmem:[#allocation10 + $0x10] sm:$0xff]  }
 0x44f   :  { %v660_v40 = vmul.f32 %v634_v33, %v634_v33  ;;  %v665_v42 = vsub.f32 %v3242_v53, %v634_v33  ;;  %v664_v45 = vsub.f32 %v3228_v43, %v634_v33  ;;  %v658_v46 = vmul.f32 0.0625, %v648_v34  ;;  %1992 = vmatprep.subr.bf16.mxu1 %v2146_v44 }
 0x450   :  { %v663_v38 = vsub.f32 %v659_v27, %v661_v28  ;;  %1993 = vmatpush3.bf16.msra.mxu1 %v2146_v44 }
 0x451   :  { %v662_v48 = vsub.f32 %v658_v46, %v660_v40  ;;  %v2147_v46 = vld [vmem:[#allocation17] sm:$0xff]  }
 0x452   :  { %v669_v47 = vadd.f32 1e-05, %v663_v38  ;;  %1998 = vmatprep.subr.bf16.mxu0 %v2147_v46 }
 0x453   :  { %v668_v49 = vadd.f32 1e-05, %v662_v48  ;;  %1999 = vmatpush3.bf16.msra.mxu0 %v2147_v46 }
 0x454   :  { %2157 = vrsqrt.f32 %v669_v47  ;;  %v2710_v47 = vmov 0.0  }
 0x455   :  { %2159 = vrsqrt.f32 %v668_v49  ;;  %2004 = vmatprep.subr.bf16.mxu0 %v2710_v47  ;;  %2010 = vmatprep.subr.bf16.mxu1 %v2710_v47 }
 0x45e   :  { %v2158_v52 = vpop.eup %2157 }
 0x45f   :  { %v674_v55 = vmul.f32 %v2158_v52, %v666_v37  ;;  %v675_v57 = vmul.f32 %v2158_v52, %v667_v30  ;;  %v2160_v39 = vpop.eup %2159 }
 0x460   :  { %v672_v61 = vmul.f32 %v2160_v39, %v664_v45  ;;  %v673_v62 = vmul.f32 %v2160_v39, %v665_v42  ;;  %v835_v39 = vstv %s1915_s4 }
 0x461   :  { %v2123_v58 = vpack.i.bf16 %v675_v57, %v674_v55  ;;  %v689_v53 = vrot.slane %v674_v55, 1  ;;  %v691_v60 = vrot.slane %v675_v57, 1  ;;  %v679_v43 = vrot.slane %v675_v57, 7 }
 0x462   :  { %v677_v63 = vrot.slane %v674_v55, 7  ;;  %v2128_v2 = vpack.i.bf16 %v673_v62, %v672_v61  ;;  %v688_v4 = vrot.slane %v672_v61, 1  ;;  %v690_v5 = vrot.slane %v673_v62, 1  ;;  %v1909_v55 = vld [vmem:[#allocation12] ss:$0 sm:$0xff] }
 0x463   :  { %2124 = vrot.lane.b32.xlu1 %v2123_v58, %s2707_s15  ;;  %v693_v0 = vsel %vm462_vm1, %v689_v53, %v691_v60  ;;  %v695_v1 = vsel %vm462_vm1, %v691_v60, %v689_v53  ;;  %v676_v10 = vrot.slane %v672_v61, 7  ;;  %v678_v13 = vrot.slane %v673_v62, 7 }
 0x464   :  { %v699_v3 = vsel %vm472_vm3, %v695_v1, 0.0  ;;  %v681_v8 = vsel %vm437_vm5, %v677_v63, %v679_v43  ;;  %v683_v9 = vsel %vm437_vm5, %v679_v43, %v677_v63  ;;  %2129 = vrot.lane.b32.xlu0 %v2128_v2, %s2707_s15  ;;  %v692_v11 = vsel %vm462_vm1, %v688_v4, %v690_v5 }
 0x465   :  { %v2138_v7 = vpack.i.bf16 %v699_v3, %v693_v0  ;;  %v694_v12 = vsel %vm462_vm1, %v690_v5, %v688_v4  ;;  %v680_v16 = vsel %vm437_vm5, %v676_v10, %v678_v13  ;;  %v682_v17 = vsel %vm437_vm5, %v678_v13, %v676_v10 }
 0x466   :  { %v697_v14 = vsel %vm472_vm3, %v694_v12, 0.0  ;;  %v686_v21 = vsel %vm444_vm6, %v683_v9, 0.0  ;;  %v684_v34 = vsel %vm444_vm6, %v682_v17, 0.0  ;;  %vm975_vm5 = vcmask 1041409  }
 0x467   :  { %2139 = vrot.lane.b32.xlu1 %v2138_v7, %s2708_s7  ;;  %v2133_v15 = vpack.i.bf16 %v697_v14, %v692_v11  ;;  %vm1148_vm6 = vcmask 122880  }
 0x469   :  { %2134 = vrot.lane.b32.xlu0 %v2133_v15, %s2708_s7 }
 0x46b   :  { %846 = vrot.lane.b32.xlu1 %v3148_v36, %s2706_s28 }
 0x46d   :  { %844 = vrot.lane.b32.xlu0 %v3139_v31, %s2706_s28 }
 0x46f   :  { %850 = vrot.lane.b32.xlu1 %v3159_v41, %s2706_s28 }
 0x471   :  { %848 = vrot.lane.b32.xlu0 %v3146_v35, %s2706_s28 }
 0x473   :  { %858 = vrot.lane.b32.xlu1 %v3148_v36, %s2709_s11 }
 0x475   :  { %856 = vrot.lane.b32.xlu0 %v3139_v31, %s2709_s11 }
 0x477   :  { %862 = vrot.lane.b32.xlu1 %v3159_v41, %s2709_s11 }
 0x479   :  { %860 = vrot.lane.b32.xlu0 %v3146_v35, %s2709_s11 }
 0x4d5   :  { %v2125_v32 = vpop.permute.xlu1 %2124 }
 0x4d6   :  { %v2127_v18 = vunpack.i.h.bf16 %v2125_v32  ;;  %v2126_v19 = vunpack.i.l.bf16 %v2125_v32  ;;  %v2130_v20 = vpop.permute.xlu0 %2129 }
 0x4d7   :  { %v2132_v23 = vunpack.i.h.bf16 %v2130_v20  ;;  %v2131_v24 = vunpack.i.l.bf16 %v2130_v20 }
 0x4d8   :  { %v734_v36 = vsel %vm615_vm11, %v686_v21, %v2126_v19  ;;  %v735_v31 = vsel %vm615_vm11, %v681_v8, %v2127_v18 }
 0x4d9   :  { %v2140_v22 = vpop.permute.xlu1 %2139  ;;  %v732_v37 = vsel %vm615_vm11, %v684_v34, %v2131_v24  ;;  %v733_v38 = vsel %vm615_vm11, %v680_v16, %v2132_v23 }
 0x4da   :  { %v2142_v25 = vunpack.i.h.bf16 %v2140_v22  ;;  %v2141_v26 = vunpack.i.l.bf16 %v2140_v22 }
 0x4db   :  { %v2135_v27 = vpop.permute.xlu0 %2134 }
 0x4dc   :  { %v739_v41 = vsel %vm736_vm14, %v734_v36, %v2141_v26  ;;  %v740_v35 = vsel %vm736_vm14, %v735_v31, %v2142_v25  ;;  %v2137_v30 = vunpack.i.h.bf16 %v2135_v27  ;;  %v2136_v33 = vunpack.i.l.bf16 %v2135_v27 }
 0x4dd   :  { %v742_v28 = vpack.c.bf16 %v740_v35, %v739_v41  ;;  %v847_v48 = vpop.permute.xlu1 %846  ;;  %v2712_v41 = vmov 1966171168  }
 0x4de   :  { %v737_v40 = vsel %vm736_vm14, %v732_v37, %v2136_v33  ;;  %v738_v42 = vsel %vm736_vm14, %v733_v38, %v2137_v30  ;;  %v1029_v35 = vunpack.c.l.s4 %v2712_v41 }
 0x4df   :  { %v741_v45 = vpack.c.bf16 %v738_v42, %v737_v40  ;;  %v845_v54 = vpop.permute.xlu0 %844 }
 0x4e0   :  { %v872_v60 = vsel %vm520_vm7, %v3179_v51, %v845_v54  ;;  %v1030_v40 = vunpack.c.0.s8 %v1029_v35 }
 0x4e1   :  { %1994 = vmatprep.mubr.msk.bf16.mxu1 %vm774_vm15, %v741_v45  ;;  %v851_v50 = vpop.permute.xlu1 %850 }
 0x4e2   :  { %1995 = vmatmul.mubr.msk.bf16.vlgmr.msra.gmra.mrb[0].mxu1 %vm774_vm15, %v742_v28  ;;  %v875_v43 = vsel %vm520_vm7, %v3208_v6, %v851_v50  ;;  %v1916_v28 = vld [vmem:[#allocation19] ss:$0 sm:$0xff] }
 0x4e3   :  { %2012 = vmatprep.mubr.msk.bf16.mxu1 %vm2711_vm0, %v2710_v47  ;;  %v849_v49 = vpop.permute.xlu0 %848 }
 0x4e4   :  { %v874_v0 = vsel %vm520_vm7, %v3189_v56, %v849_v49  ;;  %v873_v56 = vsel %vm520_vm7, %v3196_v59, %v847_v48  ;;  %v2148_v59 = vld [vmem:[#allocation14] sm:$0xff]   ;;  %v1920_v48 = vld [vmem:[#allocation16] ss:$0 sm:$0xff]  ;;  %v1033_v49 = vsub.s32 %v1030_v40, %v3136_v29 }
 0x4e5   :  { %v859_v52 = vpop.permute.xlu1 %858 }
 0x4e6   :  { %v877_v16 = vsel %vm541_vm8, %v873_v56, %v859_v52 }
 0x4e7   :  { %v857_v44 = vpop.permute.xlu0 %856 }
 0x4e8   :  { %v876_v4 = vsel %vm541_vm8, %v872_v60, %v857_v44 }
 0x4e9   :  { %v863_v5 = vpop.permute.xlu1 %862 }
 0x4ea   :  { %v879_v13 = vsel %vm541_vm8, %v875_v43, %v863_v5 }
 0x4eb   :  { %v861_v61 = vpop.permute.xlu0 %860 }
 0x4ec   :  { %v878_v51 = vsel %vm541_vm8, %v874_v0, %v861_v61  ;;  %vm1875_vm8 = vcmask 7175  }
 0x5b5   :  { %v1996_v57 = vpop.f32.mrb[0].mxu1 }
 0x5b6   :  { %v824_v58 = vadd.f32 %v1996_v57, %v1909_v55  ;;  %v815_v53 = vpop.f32.mrb[1].mxu1 }
 0x5b7   :  { %v816_v62 = vadd.f32 %v1909_v55, %v815_v53  ;;  %v1997_v63 = vpop.f32.mrb[2].mxu1 }
 0x5b8   :  { %vm832_vm1 = vcmp.ge.f32.partialorder %v824_v58, 0.0  ;;  %v838_v1 = vmul.f32 %v835_v39, %v824_v58  ;;  %v827_v2 = vadd.f32 %v1997_v63, %v1909_v55  ;;  %v818_v3 = vpop.f32.mrb[3].mxu1 }
 0x5b9   :  { %vm830_vm2 = vcmp.ge.f32.partialorder %v816_v62, 0.0  ;;  %v836_v7 = vmul.f32 %v835_v39, %v816_v62  ;;  %v819_v8 = vadd.f32 %v1909_v55, %v818_v3 }
 0x5ba   :  { %v842_v9 = vsel %vm832_vm1, %v824_v58, %v838_v1  ;;  %vm833_vm3 = vcmp.ge.f32.partialorder %v827_v2, 0.0  ;;  %v839_v6 = vmul.f32 %v835_v39, %v827_v2 }
 0x5bb   :  { %v882_v10 = vadd.f32 %v878_v51, %v842_v9  ;;  %v840_v11 = vsel %vm830_vm2, %v816_v62, %v836_v7  ;;  %vm831_vm4 = vcmp.ge.f32.partialorder %v819_v8, 0.0  ;;  %v837_v12 = vmul.f32 %v835_v39, %v819_v8 }
 0x5bc   :  { %v880_v14 = vadd.f32 %v876_v4, %v840_v11  ;;  %v843_v15 = vsel %vm833_vm3, %v827_v2, %v839_v6 }
 0x5bd   :  { %v3316_v17 = vadd.f32 %v879_v13, %v843_v15  ;;  %v841_v32 = vsel %vm831_vm4, %v819_v8, %v837_v12 }
 0x5be   :  { %v3318_v18 = vadd.f32 %v877_v16, %v841_v32 }
 0x5bf   :  { %v959_v19 = vpack.c.bf16 %v3316_v17, %v3316_v17  ;;  %v885_v22 = vpack.c.bf16 %v3316_v17, %v882_v10 }
 0x5c0   :  { %v958_v20 = vpack.c.bf16 %v3318_v18, %v3318_v18  ;;  %v884_v21 = vpack.c.bf16 %v3318_v18, %v880_v14 }
 0x5c1   :  { %v972_v23 = vunpack.c.l.b16 %v959_v19 }
 0x5c2   :  { %v971_v24 = vunpack.c.l.b16 %v958_v20  ;;  %2000 = vmatprep.mubr.msk.bf16.mxu0 %vm615_vm11, %v884_v21 }
 0x5c3   :  { %v974_v25 = vrot.slane %v972_v23, 6  ;;  %2001 = vmatmul.mubr.msk.bf16.vlgmr.msra.gmra.mrb[4].mxu0 %vm615_vm11, %v885_v22 }
 0x5c4   :  { %v973_v26 = vrot.slane %v971_v24, 7  ;;  %2005 = vmatpush3.bf16.msra.mxu0 %v2148_v59  ;;  %2006 = vmatprep.mubr.msk.bf16.mxu0 %vm2711_vm0, %v2710_v47 }
 0x5c5   :  { %2016 = vmatprep.subr.bf16.mxu0 %v2710_v47 }
 0x5c6   :  { %v976_v36 = vsel %vm975_vm5, %v974_v25, %v973_v26 }
 0x5c7   :  { %v977_v31 = vpack.c.b16 %v976_v36, %v976_v36 }
 0x5cb   :  { %2007 = vmatmul.mubr.msk.bf16.vlgmr.msra.gmra.mrb[8].mxu0 %vm615_vm11, %v977_v31 }
 0x5cc   :  { %2018 = vmatprep.mubr.msk.bf16.mxu0 %vm2711_vm0, %v2710_v47 }
 0x696   :  { %v2002_v27 = vpop.f32.mrb[4].mxu0 }
 0x697   :  { %v941_v30 = vpop.f32.mrb[5].mxu0  ;;  %v950_v34 = vadd.f32 %v2002_v27, %v1916_v28 }
 0x698   :  { %v2003_v33 = vpop.f32.mrb[6].mxu0  ;;  %v942_v42 = vadd.f32 %v1916_v28, %v941_v30 }
 0x699   :  { %v953_v37 = vadd.f32 %v2003_v33, %v1916_v28  ;;  %v944_v38 = vpop.f32.mrb[7].mxu0 }
 0x69a   :  { %v945_v45 = vadd.f32 %v1916_v28, %v944_v38 }
 0x69b   :  { %v3335_v46 = vpack.c.bf16 %v953_v37, %v950_v34 }
 0x69c   :  { %v3337_v54 = vpack.c.bf16 %v945_v45, %v942_v42 }
 0x69d   :  { %v1104_v50 = vsel %vm520_vm7, %v3335_v46, 0 }
 0x69e   :  { %v1021_v44 = vpop.f32.mrb[8].mxu0  ;;  %2017 = vmatpush3.bf16.xpose.msra.mxu0 %v1104_v50  ;;  %v1058_v52 = vsel %vm520_vm7, %v3337_v54, 0 }
 0x69f   :  { %v1022_v55 = vadd.f32 %v1920_v48, %v1021_v44  ;;  %v2008_v57 = vpop.f32.mrb[9].mxu0  ;;  %2011 = vmatpush3.bf16.xpose.msra.mxu1 %v1058_v52  ;;  %2028 = vmatprep.subr.bf16.mxu0 %v2710_v47 }
 0x6a0   :  { %v1024_v39 = vpop.f32.mrb[10].mxu0  ;;  %2022 = vmatprep.subr.bf16.mxu1 %v2710_v47 }
 0x6a1   :  { %v1034_v58 = vrot.slane %v1022_v55, %v1033_v49  ;;  %v2009_v53 = vpop.f32.mrb[11].mxu0 }
 0x6a3   :  { %v1035_v60 = vcombine.high %v1034_v58, %v1034_v58  ;;  %v1042_v29 = vrot.slane %v1034_v58, %v1033_v49 }
 0x6a5   :  { %v1049_v43 = vrot.slane %v1035_v60, %v1033_v49  ;;  %v1052_v61 = vpack.c.bf16 %v1042_v29, %v1042_v29 }
 0x6a7   :  { %v1053_v62 = vpack.c.bf16 %v1049_v43, %v1049_v43  ;;  %2013 = vmatmul.mubr.msk.bf16.vlgmr.msra.gmra.mrb[4].mxu1 %vm520_vm7, %v1052_v61 }
 0x6a8   :  { %2024 = vmatprep.mubr.msk.bf16.mxu1 %vm2711_vm0, %v2710_v47 }
 0x6a9   :  { %2019 = vmatmul.mubr.msk.bf16.vlgmr.msra.gmra.mrb[12].mxu0 %vm520_vm7, %v1053_v62 }
 0x6aa   :  { %2030 = vmatprep.mubr.msk.bf16.mxu0 %vm2711_vm0, %v2710_v47 }
 0x77a   :  { %v1094_v63 = vpop.f32.mrb[4].mxu1 }
 0x77b   :  { %v1146_v0 = vmul.f32 0.35355338, %v1094_v63  ;;  %v2014_v1 = vpop.f32.mrb[5].mxu1 }
 0x77c   :  { %v1097_v2 = vpop.f32.mrb[6].mxu1  ;;  %v1140_v3 = vpop.f32.mrb[12].mxu0 }
 0x77d   :  { %v1147_v4 = vmul.f32 0.35355338, %v1140_v3  ;;  %v2015_v5 = vpop.f32.mrb[7].mxu1  ;;  %v2020_v7 = vpop.f32.mrb[13].mxu0  ;;  %v1149_v8 = vsel %vm1148_vm6, %v1146_v0, -inf }
 0x77e   :  { %v1143_v51 = vpop.f32.mrb[14].mxu0  ;;  %1150 = vmax.xlane.f32.xlu1 %v1149_v8 }
 0x77f   :  { %v2021_v9 = vpop.f32.mrb[15].mxu0  ;;  %v1152_v6 = vsel %vm1148_vm6, %v1147_v4, -inf }
 0x780   :  { %1153 = vmax.xlane.f32.xlu0 %v1152_v6 }
 0x78f   :  { %1174 = vrot.lane.b32.xlu1 %v3337_v54, %s2713_s22 }
 0x793   :  { %1321 = vrot.lane.b32.xlu1 %v3335_v46, %s2714_s25 }
 0x797   :  { %1270 = vrot.lane.b32.xlu1 %v3337_v54, %s2714_s25 }
 0x79b   :  { %1268 = vrot.lane.b32.xlu1 %v1052_v61, %s2714_s25 }
 0x80b   :  { %v1151_v10 = vpop.xlane.xlu1 %1150 }
 0x80c   :  { %v1155_v11 = vsub.f32 %v1146_v0, %v1151_v10 }
 0x80d   :  { %v1154_v12 = vpop.xlane.xlu0 %1153 }
 0x80e   :  { %v1157_v56 = vmul.f32 1.442695, %v1155_v11  ;;  %v1156_v13 = vsub.f32 %v1147_v4, %v1154_v12 }
 0x80f   :  { %v1175_v14 = vpop.permute.xlu1 %1174 }
 0x810   :  { %2161 = vpow2.f32 %v1157_v56  ;;  %v1159_v15 = vmul.f32 1.442695, %v1156_v13  ;;  %2023 = vmatpush3.bf16.msra.mxu1 %v1175_v14 }
 0x811   :  { %2034 = vmatprep.subr.bf16.mxu1 %v2710_v47 }
 0x812   :  { %2163 = vpow2.f32 %v1159_v15 }
 0x813   :  { %v1322_v22 = vpop.permute.xlu1 %1321 }
 0x814   :  { %v1327_v28 = vsel %vm520_vm7, %v1322_v22, 0 }
 0x817   :  { %v1271_v26 = vpop.permute.xlu1 %1270 }
 0x818   :  { %v1276_v41 = vsel %vm520_vm7, %v1271_v26, 0 }
 0x81a   :  { %v2162_v16 = vpop.eup %2161 }
 0x81b   :  { %v1161_v32 = vsel %vm1148_vm6, %v2162_v16, 0.0  ;;  %v1269_v30 = vpop.permute.xlu1 %1268 }
 0x81c   :  { %v2164_v19 = vpop.eup %2163  ;;  %1162 = vadd.xlane.f32.xlu0 %v1161_v32 }
 0x81d   :  { %v1164_v20 = vsel %vm1148_vm6, %v2164_v19, 0.0 }
 0x820   :  { %1165 = vadd.xlane.f32.xlu0 %v1164_v20 }
 0x836   :  { %1221 = vrot.lane.b32.xlu0 %v3335_v46, %s2713_s22 }
 0x83a   :  { %1319 = vrot.lane.b32.xlu0 %v1053_v62, %s2714_s25 }
 0x8a9   :  { %v1163_v21 = vpop.xlane.xlu0 %1162 }
 0x8aa   :  { %2165 = vrcp.f32 %v1163_v21 }
 0x8ad   :  { %v1166_v59 = vpop.xlane.xlu0 %1165 }
 0x8ae   :  { %2167 = vrcp.f32 %v1166_v59 }
 0x8b1   :  { %v1222_v23 = vpop.permute.xlu0 %1221 }
 0x8b2   :  { %2029 = vmatpush3.bf16.msra.mxu0 %v1222_v23 }
 0x8b3   :  { %2040 = vmatprep.subr.bf16.mxu0 %v2710_v47 }
 0x8b4   :  { %v2166_v24 = vpop.eup %2165 }
 0x8b5   :  { %v1169_v25 = vmul.f32 %v2166_v24, %v2162_v16  ;;  %v1320_v33 = vpop.permute.xlu0 %1319  ;;  %v2149_v16 = vld [vmem:[#allocation20] sm:$0xff]  }
 0x8b7   :  { %v1171_v36 = vpack.c.bf16 %v1169_v25, %v1169_v25 }
 0x8b8   :  { %v2168_v31 = vpop.eup %2167 }
 0x8b9   :  { %v1170_v35 = vmul.f32 %v2168_v31, %v2164_v19  ;;  %2025 = vmatmul.mubr.msk.bf16.vlgmr.msra.gmra.mrb[8].mxu1 %vm615_vm11, %v1171_v36 }
 0x8ba   :  { %2035 = vmatpush3.bf16.xpose.msra.mxu1 %v1276_v41  ;;  %2036 = vmatprep.mubr.msk.bf16.mxu1 %vm2711_vm0, %v2710_v47 }
 0x8bb   :  { %v1172_v27 = vpack.c.bf16 %v1170_v35, %v1170_v35  ;;  %2046 = vmatprep.subr.bf16.mxu1 %v2710_v47 }
 0x8bd   :  { %2031 = vmatmul.mubr.msk.bf16.vlgmr.msra.gmra.mrb[16].mxu0 %vm615_vm11, %v1172_v27 }
 0x8be   :  { %2041 = vmatpush3.bf16.xpose.msra.mxu0 %v1327_v28  ;;  %2042 = vmatprep.mubr.msk.bf16.mxu0 %vm2711_vm0, %v2710_v47 }
 0x8bf   :  { %2052 = vmatprep.subr.bf16.mxu0 %v2710_v47 }
 0x8c1   :  { %2037 = vmatmul.mubr.msk.bf16.vlgmr.msra.gmra.mrb[12].mxu1 %vm520_vm7, %v1269_v30 }
 0x8c2   :  { %2048 = vmatprep.mubr.msk.bf16.mxu1 %vm2711_vm0, %v2710_v47 }
 0x8c5   :  { %2043 = vmatmul.mubr.msk.bf16.vlgmr.msra.gmra.mrb[20].mxu0 %vm520_vm7, %v1320_v33  ;;  %v1931_v33 = vld [vmem:[#allocation22] ss:$0 sm:$0xff] }
 0x8c6   :  { %2054 = vmatprep.mubr.msk.bf16.mxu0 %vm2711_vm0, %v2710_v47 }
 0x98c   :  { %v3378_v34 = vpop.f32.mrb[8].mxu1 }
 0x98d   :  { %v2026_v37 = vpop.f32.mrb[9].mxu1 }
 0x98e   :  { %v1217_v38 = vpop.f32.mrb[10].mxu1 }
 0x98f   :  { %v2027_v40 = vpop.f32.mrb[11].mxu1 }
 0x990   :  { %v3380_v42 = vpop.f32.mrb[16].mxu0 }
 0x991   :  { %v2032_v45 = vpop.f32.mrb[17].mxu0 }
 0x992   :  { %v1264_v48 = vpop.f32.mrb[18].mxu0 }
 0x993   :  { %v2033_v49 = vpop.f32.mrb[19].mxu0 }
 0x994   :  { %v1312_v50 = vpop.f32.mrb[12].mxu1 }
 0x995   :  { %v1369_v44 = vmul.f32 0.35355338, %v1312_v50  ;;  %v2038_v52 = vpop.f32.mrb[13].mxu1 }
 0x996   :  { %v1315_v55 = vpop.f32.mrb[14].mxu1 }
 0x997   :  { %v2039_v57 = vpop.f32.mrb[15].mxu1  ;;  %v1371_v39 = vsel %vm1148_vm6, %v1369_v44, -inf }
 0x998   :  { %v1363_v58 = vpop.f32.mrb[20].mxu0  ;;  %1372 = vmax.xlane.f32.xlu1 %v1371_v39 }
 0x999   :  { %v1370_v53 = vmul.f32 0.35355338, %v1363_v58  ;;  %v2044_v60 = vpop.f32.mrb[21].mxu0 }
 0x99a   :  { %v1366_v29 = vpop.f32.mrb[22].mxu0 }
 0x99b   :  { %v2045_v43 = vpop.f32.mrb[23].mxu0  ;;  %v1374_v61 = vsel %vm1148_vm6, %v1370_v53, -inf  ;;  %v2150_v29 = vld [vmem:[#allocation26] sm:$0xff]  }
 0x99c   :  { %1375 = vmax.xlane.f32.xlu0 %v1374_v61 }
 0x9a9   :  { %1395 = vrot.lane.b32.xlu1 %v3337_v54, %s2715_s18 }
 0xa25   :  { %v1373_v62 = vpop.xlane.xlu1 %1372 }
 0xa26   :  { %v1377_v63 = vsub.f32 %v1369_v44, %v1373_v62 }
 0xa28   :  { %v1379_v0 = vmul.f32 1.442695, %v1377_v63 }
 0xa29   :  { %v1376_v1 = vpop.xlane.xlu0 %1375  ;;  %v1396_v2 = vpop.permute.xlu1 %1395 }
 0xa2a   :  { %2169 = vpow2.f32 %v1379_v0  ;;  %v1378_v3 = vsub.f32 %v1370_v53, %v1376_v1  ;;  %2047 = vmatpush3.bf16.msra.mxu1 %v1396_v2 }
 0xa2b   :  { %2058 = vmatprep.subr.bf16.mxu1 %v2710_v47 }
 0xa2c   :  { %v1381_v4 = vmul.f32 1.442695, %v1378_v3 }
 0xa2e   :  { %2171 = vpow2.f32 %v1381_v4 }
 0xa34   :  { %v2170_v5 = vpop.eup %2169 }
 0xa35   :  { %v1383_v7 = vsel %vm1148_vm6, %v2170_v5, 0.0 }
 0xa36   :  { %1384 = vadd.xlane.f32.xlu0 %v1383_v7 }
 0xa38   :  { %v2172_v8 = vpop.eup %2171 }
 0xa39   :  { %v1386_v51 = vsel %vm1148_vm6, %v2172_v8, 0.0 }
 0xa3a   :  { %1387 = vadd.xlane.f32.xlu0 %v1386_v51 }
 0xa50   :  { %1441 = vrot.lane.b32.xlu0 %v3335_v46, %s2715_s18 }
 0xac3   :  { %v1385_v54 = vpop.xlane.xlu0 %1384 }
 0xac4   :  { %2173 = vrcp.f32 %v1385_v54 }
 0xac7   :  { %v1388_v9 = vpop.xlane.xlu0 %1387 }
 0xac8   :  { %2175 = vrcp.f32 %v1388_v9 }
 0xacb   :  { %v1442_v6 = vpop.permute.xlu0 %1441 }
 0xacc   :  { %2053 = vmatpush3.bf16.msra.mxu0 %v1442_v6 }
 0xacd   :  { %2064 = vmatprep.subr.bf16.mxu0 %v2710_v47 }
 0xace   :  { %v2174_v10 = vpop.eup %2173 }
 0xacf   :  { %v1391_v11 = vmul.f32 %v2174_v10, %v2170_v5  ;;  %v1934_v10 = vld [vmem:[#allocation23] ss:$0 sm:$0xff] }
 0xad1   :  { %v1393_v12 = vpack.c.bf16 %v1391_v11, %v1391_v11 }
 0xad2   :  { %v2176_v56 = vpop.eup %2175 }
 0xad3   :  { %v1392_v13 = vmul.f32 %v2176_v56, %v2172_v8  ;;  %2049 = vmatmul.mubr.msk.bf16.vlgmr.msra.gmra.mrb[16].mxu1 %vm615_vm11, %v1393_v12 }
 0xad4   :  { %2060 = vmatprep.mubr.msk.bf16.mxu1 %vm2711_vm0, %v2710_v47  ;;  %2059 = vmatpush3.bf16.msra.mxu1 %v2149_v16 }
 0xad5   :  { %v1394_v14 = vpack.c.bf16 %v1392_v13, %v1392_v13  ;;  %2070 = vmatprep.subr.bf16.mxu1 %v2710_v47  ;;  %v1935_v13 = vld [vmem:[#allocation25] ss:$0 sm:$0xff] }
 0xad7   :  { %2055 = vmatmul.mubr.msk.bf16.vlgmr.msra.gmra.mrb[24].mxu0 %vm615_vm11, %v1394_v14 }
 0xad8   :  { %2066 = vmatprep.mubr.msk.bf16.mxu0 %vm2711_vm0, %v2710_v47  ;;  %2065 = vmatpush3.bf16.msra.mxu0 %v2150_v29 }
 0xba6   :  { %v1435_v46 = vpop.f32.mrb[16].mxu1 }
 0xba7   :  { %v2050_v15 = vpop.f32.mrb[17].mxu1 }
 0xba8   :  { %v1438_v32 = vpop.f32.mrb[18].mxu1 }
 0xba9   :  { %v2051_v19 = vpop.f32.mrb[19].mxu1 }
 0xbaa   :  { %v1481_v20 = vpop.f32.mrb[24].mxu0 }
 0xbab   :  { %1491 = vrot.lane.b32.xlu1 %v1481_v20, %s2706_s28  ;;  %v2056_v21 = vpop.f32.mrb[25].mxu0 }
 0xbac   :  { %v1484_v59 = vpop.f32.mrb[26].mxu0 }
 0xbad   :  { %v2057_v22 = vpop.f32.mrb[27].mxu0 }
 0xbaf   :  { %1489 = vrot.lane.b32.xlu1 %v1435_v46, %s2706_s28 }
 0xc1d   :  { %v1492_v23 = vpop.permute.xlu1 %1491 }
 0xc1e   :  { %v1496_v24 = vsel %vm520_vm7, %v3380_v42, %v1492_v23 }
 0xc1f   :  { %v1498_v25 = vpack.c.bf16 %v1496_v24, %v1496_v24 }
 0xc21   :  { %v1511_v26 = vunpack.c.l.b16 %v1498_v25  ;;  %v1490_v36 = vpop.permute.xlu1 %1489 }
 0xc22   :  { %v1495_v31 = vsel %vm520_vm7, %v3378_v34, %v1490_v36  ;;  %vm1576_vm7 = vcmask 130055   ;;  %v1936_v36 = vld [vmem:[#allocation28] ss:$0 sm:$0xff] }
 0xc23   :  { %v1497_v41 = vpack.c.bf16 %v1495_v31, %v1495_v31  ;;  %v1512_v35 = vrot.slane %v1511_v26, 7  ;;  %v2152_v26 = vld [vmem:[#allocation29 + $0x8] sm:$0xff]  }
 0xc25   :  { %v1510_v27 = vunpack.c.l.b16 %v1497_v41 }
 0xc27   :  { %v1513_v28 = vsel %vm975_vm5, %v1512_v35, %v1510_v27 }
 0xc28   :  { %v1514_v30 = vpack.c.b16 %v1513_v28, %v1513_v28 }
 0xc2a   :  { %2061 = vmatmul.mubr.msk.bf16.vlgmr.msra.gmra.mrb[20].mxu1 %vm615_vm11, %v1514_v30 }
 0xc2b   :  { %2074 = vmatprep.mubr.msk.bf16.mxu1 %vm2711_vm0, %v2710_v47 }
 0xcfd   :  { %v1558_v37 = vpop.f32.mrb[20].mxu1 }
 0xcfe   :  { %v1559_v38 = vadd.f32 %v1931_v33, %v1558_v37  ;;  %v2062_v40 = vpop.f32.mrb[21].mxu1  ;;  %v1939_v37 = vld [vmem:[#allocation31] ss:$0 sm:$0xff] }
 0xcff   :  { %v1561_v42 = vpop.f32.mrb[22].mxu1 }
 0xd00   :  { %v1565_v45 = vrot.slane %v1559_v38, 1  ;;  %v1566_v48 = vrot.slane %v1559_v38, 2  ;;  %v2063_v49 = vpop.f32.mrb[23].mxu1 }
 0xd02   :  { %v1569_v34 = vadd.f32 %v1565_v45, %v3318_v18  ;;  %v1570_v50 = vadd.f32 %v1566_v48, %v3316_v17  ;;  %v2151_v18 = vld [vmem:[#allocation29] sm:$0xff]  }
 0xd03   :  { %2071 = vmatpush3.bf16.msra.mxu1 %v2151_v18 }
 0xd04   :  { %v1577_v44 = vsel %vm1576_vm7, %v1569_v34, 0.0  ;;  %v1573_v52 = vrot.slane %v1570_v50, 7  ;;  %v1586_v55 = vmul.f32 %v1570_v50, %v1570_v50  ;;  %v1585_v53 = vmul.f32 %v1569_v34, %v1569_v34  ;;  %2072 = vmatprep.subr.bf16.mxu1 %v2710_v47 }
 0xd05   :  { %1578 = vadd.xlane.f32.xlu1 %v1577_v44 }
 0xd06   :  { %v1580_v57 = vsel %vm1148_vm6, %v1573_v52, 0.0  ;;  %v1589_v39 = vrot.slane %v1586_v55, 7  ;;  %v1592_v60 = vsel %vm1576_vm7, %v1585_v53, 0.0 }
 0xd07   :  { %1581 = vadd.xlane.f32.xlu0 %v1580_v57  ;;  %2073 = vmatpush3.bf16.msra.mxu1 %v2152_v26 }
 0xd08   :  { %v1595_v58 = vsel %vm1148_vm6, %v1589_v39, 0.0 }
 0xd0b   :  { %1596 = vadd.xlane.f32.xlu0 %v1595_v58 }
 0xd0f   :  { %1593 = vadd.xlane.f32.xlu0 %v1592_v60 }
 0xd92   :  { %v1579_v61 = vpop.xlane.xlu1 %1578 }
 0xd93   :  { %v1583_v63 = vmul.f32 0.0625, %v1579_v61 }
 0xd94   :  { %v1582_v17 = vpop.xlane.xlu0 %1581 }
 0xd95   :  { %v1584_v43 = vmul.f32 0.0625, %v1582_v17  ;;  %v1600_v4 = vmul.f32 %v1583_v63, %v1583_v63  ;;  %v1609_v11 = vsub.f32 %v1569_v34, %v1583_v63 }
 0xd97   :  { %v1601_v0 = vmul.f32 %v1584_v43, %v1584_v43  ;;  %v1606_v54 = vrot.slane %v1584_v43, 1 }
 0xd98   :  { %v1597_v62 = vpop.xlane.xlu0 %1596 }
 0xd99   :  { %v1599_v1 = vmul.f32 0.0625, %v1597_v62  ;;  %v1610_v6 = vsub.f32 %v1570_v50, %v1606_v54 }
 0xd9b   :  { %v1603_v2 = vsub.f32 %v1599_v1, %v1601_v0 }
 0xd9c   :  { %v1594_v3 = vpop.xlane.xlu0 %1593 }
 0xd9d   :  { %v1612_v5 = vadd.f32 1e-05, %v1603_v2  ;;  %v1598_v7 = vmul.f32 0.0625, %v1594_v3 }
 0xd9f   :  { %2177 = vrsqrt.f32 %v1612_v5  ;;  %v1602_v8 = vsub.f32 %v1598_v7, %v1600_v4 }
 0xda1   :  { %v1611_v51 = vadd.f32 1e-05, %v1602_v8 }
 0xda3   :  { %2179 = vrsqrt.f32 %v1611_v51 }
 0xda9   :  { %v2178_v9 = vpop.eup %2177 }
 0xdaa   :  { %v1617_v47 = vrot.slane %v2178_v9, 1 }
 0xdac   :  { %v1621_v12 = vmul.f32 %v1617_v47, %v1610_v6  ;;  %v1943_v47 = vld [vmem:[#allocation32] ss:$0 sm:$0xff] }
 0xdad   :  { %v2180_v56 = vpop.eup %2179 }
 0xdae   :  { %v1630_v14 = vmul.f32 %v1934_v10, %v1621_v12  ;;  %v1620_v46 = vmul.f32 %v2180_v56, %v1609_v11  ;;  %v1944_v56 = vld [vmem:[#allocation34] ss:$0 sm:$0xff] }
 0xdb0   :  { %v1639_v15 = vadd.f32 %v1935_v13, %v1630_v14  ;;  %v1629_v16 = vmul.f32 %v1934_v10, %v1620_v46  ;;  %v1945_v46 = vld [vmem:[#allocation35] ss:$0 sm:$0xff] }
 0xdb2   :  { %v1641_v32 = vpack.c.bf16 %v1639_v15, %v1639_v15  ;;  %v1638_v19 = vadd.f32 %v1935_v13, %v1629_v16 }
 0xdb4   :  { %v1654_v20 = vunpack.c.l.b16 %v1641_v32  ;;  %v1640_v21 = vpack.c.bf16 %v1638_v19, %v1638_v19 }
 0xdb6   :  { %v1653_v59 = vunpack.c.l.b16 %v1640_v21  ;;  %v1656_v22 = vrot.slane %v1654_v20, 6 }
 0xdb8   :  { %v1655_v23 = vrot.slane %v1653_v59, 7 }
 0xdba   :  { %v1657_v24 = vsel %vm975_vm5, %v1656_v22, %v1655_v23  ;;  %v1872_v23 = vstv %s3488_s12 }
 0xdbb   :  { %v1658_v25 = vpack.c.b16 %v1657_v24, %v1657_v24 }
 0xdbd   :  { %2067 = vmatmul.mubr.msk.bf16.vlgmr.msra.gmra.mrb[28].mxu0 %vm615_vm11, %v1658_v25 }
 0xe90   :  { %v1702_v31 = vpop.f32.mrb[28].mxu0 }
 0xe91   :  { %v1703_v41 = vadd.f32 %v1936_v36, %v1702_v31  ;;  %v2068_v35 = vpop.f32.mrb[29].mxu0 }
 0xe92   :  { %v1705_v27 = vpop.f32.mrb[30].mxu0 }
 0xe93   :  { %v1708_v28 = vmax.f32 %v1703_v41, 0.0  ;;  %v2069_v30 = vpop.f32.mrb[31].mxu0 }
 0xe95   :  { %v1709_v33 = vpack.c.bf16 %v1708_v28, %v1708_v28 }
 0xe97   :  { %2075 = vmatmul.mubr.msk.bf16.vlgmr.msra.gmra.mrb[24].mxu1 %vm736_vm14, %v1709_v33 }
 0xf6a   :  { %v1770_v38 = vpop.f32.mrb[24].mxu1 }
 0xf6b   :  { %v1771_v40 = vadd.f32 %v1939_v37, %v1770_v38  ;;  %v2076_v42 = vpop.f32.mrb[25].mxu1 }
 0xf6c   :  { %v1773_v45 = vpop.f32.mrb[26].mxu1 }
 0xf6d   :  { %v1777_v48 = vrot.slane %v1771_v40, 1  ;;  %v1778_v49 = vrot.slane %v1771_v40, 2  ;;  %v2077_v34 = vpop.f32.mrb[27].mxu1 }
 0xf6f   :  { %v1782_v50 = vadd.f32 %v1778_v49, %v1639_v15  ;;  %v1781_v44 = vadd.f32 %v1777_v48, %v1638_v19 }
 0xf71   :  { %v1785_v52 = vrot.slane %v1782_v50, 7  ;;  %v1797_v55 = vmul.f32 %v1782_v50, %v1782_v50  ;;  %v1796_v53 = vmul.f32 %v1781_v44, %v1781_v44  ;;  %v1788_v60 = vsel %vm1576_vm7, %v1781_v44, 0.0 }
 0xf73   :  { %v1791_v57 = vsel %vm1148_vm6, %v1785_v52, 0.0  ;;  %v1800_v39 = vrot.slane %v1797_v55, 7  ;;  %v1803_v29 = vsel %vm1576_vm7, %v1796_v53, 0.0 }
 0xf74   :  { %1792 = vadd.xlane.f32.xlu0 %v1791_v57 }
 0xf75   :  { %v1806_v58 = vsel %vm1148_vm6, %v1800_v39, 0.0 }
 0xf76   :  { %1807 = vadd.xlane.f32.xlu1 %v1806_v58 }
 0xf78   :  { %1789 = vadd.xlane.f32.xlu0 %v1788_v60 }
 0xf7a   :  { %1804 = vadd.xlane.f32.xlu1 %v1803_v29 }
0x1001   :  { %v1793_v18 = vpop.xlane.xlu0 %1792 }
0x1002   :  { %v1795_v17 = vmul.f32 0.0625, %v1793_v18 }
0x1003   :  { %v1808_v43 = vpop.xlane.xlu1 %1807 }
0x1004   :  { %v1812_v61 = vmul.f32 %v1795_v17, %v1795_v17  ;;  %v1810_v62 = vmul.f32 0.0625, %v1808_v43  ;;  %v1817_v51 = vrot.slane %v1795_v17, 1 }
0x1005   :  { %v1790_v63 = vpop.xlane.xlu0 %1789 }
0x1006   :  { %v1814_v0 = vsub.f32 %v1810_v62, %v1812_v61  ;;  %v1794_v1 = vmul.f32 0.0625, %v1790_v63  ;;  %v1821_v9 = vsub.f32 %v1782_v50, %v1817_v51 }
0x1007   :  { %v1805_v2 = vpop.xlane.xlu1 %1804 }
0x1008   :  { %v1823_v3 = vadd.f32 1e-05, %v1814_v0  ;;  %v1811_v4 = vmul.f32 %v1794_v1, %v1794_v1  ;;  %v1809_v5 = vmul.f32 0.0625, %v1805_v2  ;;  %v1820_v11 = vsub.f32 %v1781_v44, %v1794_v1 }
0x100a   :  { %2181 = vrsqrt.f32 %v1823_v3  ;;  %v1813_v7 = vsub.f32 %v1809_v5, %v1811_v4 }
0x100c   :  { %v1822_v8 = vadd.f32 1e-05, %v1813_v7 }
0x100e   :  { %2183 = vrsqrt.f32 %v1822_v8 }
0x1014   :  { %v2182_v54 = vpop.eup %2181 }
0x1015   :  { %v1828_v6 = vrot.slane %v2182_v54, 1 }
0x1017   :  { %v1832_v10 = vmul.f32 %v1828_v6, %v1821_v9 }
0x1018   :  { %v2184_v12 = vpop.eup %2183 }
0x1019   :  { %v1841_v13 = vmul.f32 %v1943_v47, %v1832_v10  ;;  %v1831_v14 = vmul.f32 %v2184_v12, %v1820_v11 }
0x101b   :  { %v1850_v15 = vadd.f32 %v1944_v56, %v1841_v13  ;;  %v1840_v16 = vmul.f32 %v1943_v47, %v1831_v14 }
0x101d   :  { %v1859_v32 = vmul.f32 %v1945_v46, %v1850_v15  ;;  %v1849_v19 = vadd.f32 %v1944_v56, %v1840_v16 }
0x101f   :  { %v1862_v20 = vrot.slane %v1859_v32, 7  ;;  %v1858_v21 = vmul.f32 %v1945_v46, %v1849_v19 }
0x1021   :  { %v1868_v59 = vsel %vm1148_vm6, %v1862_v20, 0.0  ;;  %v1865_v22 = vsel %vm1576_vm7, %v1858_v21, 0.0 }
0x1022   :  { %1869 = vadd.xlane.f32.xlu1 %v1868_v59  ;;  %1866 = vadd.xlane.f32.xlu0 %v1865_v22 }
0x10af   :  { %v1870_v24 = vpop.xlane.xlu1 %1869  ;;  %v1867_v25 = vpop.xlane.xlu0 %1866 }
0x10b0   :  { %v1874_v26 = vadd.f32 %v1872_v23, %v1870_v24  ;;  %v1873_v36 = vadd.f32 %v1872_v23, %v1867_v25 }
0x10b2   :  { %1876 = vst.msk [vmem:[#allocation37 - $0x7] sm:$0x80] %vm1875_vm8, %v1873_v36 }
0x10b3   :  { %1878 = vst.msk [vmem:[#allocation37 + $0x1] sm:$0x1] %vm1877_vm9, %v1874_v26 }
0x10b4   :  { %2646 = shalt.err (!%p2643_p13)
}
0x10b5   :  { %s3489_s9 = sld [smem:[#allocation60_spill]] }
0x10bb   :  { %s2647_s13 = scalar_lea.hbm %s3489_s9, 32 }
0x10bc   :  { %p2648_p0 = scmp.ne.s32.totalorder %s3489_s9, %s2647_s13  ;;  %p2651_p1 = scmp.lt.u32.totalorder %s2647_s13, %s3489_s9 }
0x10be   :  { %p2653_p2 = pnand %p2651_p1, %p2648_p0 }
0x10c0   :  { %2656 = shalt.err (!%p2653_p2)
}
0x10c1   :  { %1888 = dma.vmem_to_hbm [thread:$0]  %s1886_s16, 32, %s3489_s9, [#allocation5]  }
0x10c2   :  { %2681 = dma.done.wait [#allocation5], 32  }
0x10c3   :  { %2682 = vsyncadd [#allocation5], 4294967264 }
0x10c4   :  { %1892 = vsyncpa [#allocation4], 1 }
0x10c5   :  { %1893 = vsyncpa [#allocation8], 1 }
0x10c6   :  { %1894 = vsyncpa [#allocation11], 1 }
0x10c7   :  { %1895 = vsyncpa [#allocation15], 1 }
0x10c8   :  { %1896 = vsyncpa [#allocation18], 1 }
0x10c9   :  { %1897 = vsyncpa [#allocation21], 1 }
0x10ca   :  { %1898 = vsyncpa [#allocation24], 1 }
0x10cb   :  { %1899 = vsyncpa [#allocation27], 1 }
0x10cc   :  { %1900 = vsyncpa [#allocation30], 1 }
0x10cd   :  { %1901 = vsyncpa [#allocation33], 1 }
0x10ce   :  { %1902 = vsyncpa [#allocation36], 1 }
0x10cf   :  { %1903 = vsyncpa [#allocation5], 1 }
0x10d0   :  { %1904 = vsyncpa [#allocation6], 1 }

</bundles_post_ra>
